<compile_context>
chip_gen: v7x
topology: tpu7x:2x2x1
jax: 0.10.0
libtpu: 0.0.40
codegen_flags: <defaults>
</compile_context>

<pallas_src>
import math

import jax
import jax.numpy as jnp
from jax.experimental import pallas as pl
from jax.experimental.pallas import tpu as pltpu


# ---------------------------------------------------------------------------
# In-kernel helper: Conv1d(k=3, padding='same') + ReLU + MaxPool1d(2) on one
# sample, expressed as a single im2col matmul.  w is stored as (3*Cin, Cout):
#   rows [0:Cin)      -> kernel tap k=0 (x[t-1])
#   rows [Cin:2Cin)   -> kernel tap k=1 (x[t])
#   rows [2Cin:3Cin)  -> kernel tap k=2 (x[t+1])
# (a PyTorch Conv1d weight (Cout, Cin, 3) converts via
#  w.permute(2, 1, 0).reshape(3 * Cin, Cout))
# ---------------------------------------------------------------------------
def _conv_relu_pool(x, w, b):
    L, Cin = x.shape
    Cout = w.shape[1]
    zero = jnp.zeros((1, Cin), x.dtype)
    x_m1 = jnp.concatenate([zero, x[:-1, :]], axis=0)   # x[t-1], zero-padded left
    x_p1 = jnp.concatenate([x[1:, :], zero], axis=0)    # x[t+1], zero-padded right
    xcat = jnp.concatenate([x_m1, x, x_p1], axis=1)     # (L, 3*Cin)  im2col
    y = jnp.dot(xcat, w, preferred_element_type=jnp.float32) + b
    y = jnp.maximum(y, 0.0)                             # ReLU
    return jnp.max(y.reshape(L // 2, 2, Cout), axis=1)  # MaxPool1d(2)


# ---------------------------------------------------------------------------
# Fused forward kernel: one batch element per grid step.  All weights live in
# VMEM as full-array blocks with constant index maps (fetched once, never
# re-DMA'd), all activations stay in vregs/VMEM — no HBM round trips between
# layers.
# ---------------------------------------------------------------------------
def totem_kernel(x_ref, cw1, cb1, cw2, cb2, cw3, cb3,
                 fw1, fb1, fw2, fb2, o_ref):
    x = x_ref[0]                                        # (L, Cin)

    h = _conv_relu_pool(x, cw1[...], cb1[...])          # (L/2, 64)
    h = _conv_relu_pool(h, cw2[...], cb2[...])          # (L/4, 128)
    h = _conv_relu_pool(h, cw3[...], cb3[...])          # (L/8, 256)

    # Flatten time-major (row index = t * 256 + c) with a cheap lane-axis
    # concat; the PyTorch channel-major flatten order is absorbed into fw1's
    # row permutation (done once at init), so no transpose is needed here.
    Lp, C = h.shape
    flat = jnp.concatenate([h[t:t + 1, :] for t in range(Lp)], axis=1)  # (1, Lp*256)

    z = jnp.dot(flat, fw1[...], preferred_element_type=jnp.float32) + fb1[...]
    z = jnp.maximum(z, 0.0)                                             # fc1 + ReLU
    logits = jnp.dot(z, fw2[...], preferred_element_type=jnp.float32) + fb2[...]

    # softmax(dim=1); exact divide — num_classes is tiny, and the approximate
    # hardware reciprocal is not accurate enough for tight row-sum checks.
    m = jnp.max(logits, axis=1, keepdims=True)
    e = jnp.exp(logits - m)
    denom = jnp.sum(e, axis=1, keepdims=True)
    o_ref[0] = e / denom


def _const_spec(shape):
    """Full-array block, same block for every grid step (weights/biases)."""
    n = len(shape)

    def idx(i):
        return (0,) * n

    return pl.BlockSpec(shape, idx)


def totem_forward(x, p):
    # x: (B, L, C) — same as the PyTorch input before its internal permute.
    B, L, Cin = x.shape
    assert L % 8 == 0, "seq_len must be a multiple of 8 (three MaxPool1d(2))"
    num_classes = p["fw2"].shape[1]

    out = pl.pallas_call(
        totem_kernel,
        out_shape=jax.ShapeDtypeStruct((B, 1, num_classes), jnp.float32),
        grid=(B,),
        in_specs=[
            pl.BlockSpec((1, L, Cin), lambda i: (i, 0, 0)),
            _const_spec(p["cw1"].shape), _const_spec(p["cb1"].shape),
            _const_spec(p["cw2"].shape), _const_spec(p["cb2"].shape),
            _const_spec(p["cw3"].shape), _const_spec(p["cb3"].shape),
            _const_spec(p["fw1"].shape), _const_spec(p["fb1"].shape),
            _const_spec(p["fw2"].shape), _const_spec(p["fb2"].shape),
        ],
        out_specs=pl.BlockSpec((1, 1, num_classes), lambda i: (i, 0, 0)),
        compiler_params=pltpu.CompilerParams(
            dimension_semantics=("parallel",)),
    )(x, p["cw1"], p["cb1"], p["cw2"], p["cb2"], p["cw3"], p["cb3"],
      p["fw1"], p["fb1"], p["fw2"], p["fb2"])

    return out.reshape(B, num_classes)


# ---------------------------------------------------------------------------
# Pure-JAX reference (same parameter layout / flatten convention) for checking.
# ---------------------------------------------------------------------------
def totem_reference(x, p):
    def conv_relu_pool(xb, w, b):
        B, L, Cin = xb.shape
        Cout = w.shape[1]
        zero = jnp.zeros((B, 1, Cin), xb.dtype)
        x_m1 = jnp.concatenate([zero, xb[:, :-1, :]], axis=1)
        x_p1 = jnp.concatenate([xb[:, 1:, :], zero], axis=1)
        xcat = jnp.concatenate([x_m1, xb, x_p1], axis=2)        # (B, L, 3*Cin)
        y = jnp.einsum("blk,kc->blc", xcat, w,
                       preferred_element_type=jnp.float32) + b
        y = jnp.maximum(y, 0.0)
        return jnp.max(y.reshape(B, L // 2, 2, Cout), axis=2)

    h = conv_relu_pool(x, p["cw1"], p["cb1"])
    h = conv_relu_pool(h, p["cw2"], p["cb2"])
    h = conv_relu_pool(h, p["cw3"], p["cb3"])
    B = h.shape[0]
    flat = h.reshape(B, -1)                       # time-major flatten (matches fw1)
    z = jnp.maximum(flat @ p["fw1"] + p["fb1"], 0.0)
    logits = z @ p["fw2"] + p["fb2"]
    return jax.nn.softmax(logits, axis=1)


def init_params(key, seq_len, in_channels, num_classes):
    """Deterministic synthetic init (PyTorch-style U(-1/sqrt(fan_in), +))."""
    def uni(k, shape, fan_in):
        bnd = 1.0 / math.sqrt(fan_in)
        return jax.random.uniform(k, shape, jnp.float32, -bnd, bnd)

    ks = jax.random.split(key, 10)
    c1, c2, c3 = 64, 128, 256
    Lp = seq_len // 8
    flat_dim = c3 * Lp
    hidden = 512
    return {
        # conv weights stored as im2col (3*Cin, Cout), see _conv_relu_pool.
        "cw1": uni(ks[0], (3 * in_channels, c1), in_channels * 3),
        "cb1": uni(ks[1], (1, c1), in_channels * 3),
        "cw2": uni(ks[2], (3 * c1, c2), c1 * 3),
        "cb2": uni(ks[3], (1, c2), c1 * 3),
        "cw3": uni(ks[4], (3 * c2, c3), c2 * 3),
        "cb3": uni(ks[5], (1, c3), c2 * 3),
        # fc1 rows are TIME-MAJOR (row index = t * 256 + c).  To load a real
        # PyTorch fc1.weight (hidden, 256*Lp, channel-major flatten), convert:
        #   fw1 = w.T.reshape(256, Lp, hidden).transpose(1, 0, 2).reshape(Lp*256, hidden)
        "fw1": uni(ks[6], (flat_dim, hidden), flat_dim),
        "fb1": uni(ks[7], (1, hidden), flat_dim),
        "fw2": uni(ks[8], (hidden, num_classes), hidden),
        "fb2": uni(ks[9], (1, num_classes), hidden),
    }


if __name__ == "__main__":
    B, L, C = 2, 16, 4          # input_shape = (seq_len, channels) = (16, 4)
    num_classes = 5

    key = jax.random.PRNGKey(0)
    kx, kp = jax.random.split(key)
    x = jax.random.normal(kx, (B, L, C), jnp.float32)
    params = init_params(kp, L, C, num_classes)

    out = jax.jit(totem_forward)(x, params)
    out = jax.block_until_ready(out)

    assert out.shape == (B, num_classes)
    # softmax rows must sum to 1 (exact divide in-kernel, so this is tight).
    sums = jnp.sum(out, axis=1)
    assert bool(jnp.allclose(sums, 1.0, atol=1e-3)), sums
    # cross-check against the pure-JAX reference (loose tol: MXU matmul paths
    # inside/outside the kernel may use different f32 precision strategies).
    ref = jax.block_until_ready(totem_reference(x, params))
    assert bool(jnp.allclose(out, ref, atol=2e-2)), float(jnp.max(jnp.abs(out - ref)))
    print("KERNEL_OK")
</pallas_src>

<mosaic_0001>
module attributes {stable_mosaic.version = 11 : i64} {
  func.func @totem_kernel(%arg0: i32, %arg1: memref<1x16x4xf32, #tpu.memory_space<vmem>>, %arg2: memref<12x64xf32, #tpu.memory_space<vmem>>, %arg3: memref<1x64xf32, #tpu.memory_space<vmem>>, %arg4: memref<192x128xf32, #tpu.memory_space<vmem>>, %arg5: memref<1x128xf32, #tpu.memory_space<vmem>>, %arg6: memref<384x256xf32, #tpu.memory_space<vmem>>, %arg7: memref<1x256xf32, #tpu.memory_space<vmem>>, %arg8: memref<512x512xf32, #tpu.memory_space<vmem>>, %arg9: memref<1x512xf32, #tpu.memory_space<vmem>>, %arg10: memref<512x5xf32, #tpu.memory_space<vmem>>, %arg11: memref<1x5xf32, #tpu.memory_space<vmem>>, %arg12: memref<1x1x5xf32, #tpu.memory_space<vmem>>) attributes {dimension_semantics = [#tpu.dimension_semantics<parallel>], iteration_bounds = array<i64: 2>, scalar_prefetch = 0 : i64, scratch_operands = 0 : i64, tpu.core_type = #tpu.core_type<tc>, window_params = [{transform_indices = @transform_0, window_bounds = array<i64: 1, 16, 4>}, {pipeline_mode = #tpu.pipeline_mode<synchronous>, transform_indices = @transform_1, window_bounds = array<i64: 12, 64>}, {pipeline_mode = #tpu.pipeline_mode<synchronous>, transform_indices = @transform_2, window_bounds = array<i64: 1, 64>}, {pipeline_mode = #tpu.pipeline_mode<synchronous>, transform_indices = @transform_3, window_bounds = array<i64: 192, 128>}, {pipeline_mode = #tpu.pipeline_mode<synchronous>, transform_indices = @transform_4, window_bounds = array<i64: 1, 128>}, {pipeline_mode = #tpu.pipeline_mode<synchronous>, transform_indices = @transform_5, window_bounds = array<i64: 384, 256>}, {pipeline_mode = #tpu.pipeline_mode<synchronous>, transform_indices = @transform_6, window_bounds = array<i64: 1, 256>}, {pipeline_mode = #tpu.pipeline_mode<synchronous>, transform_indices = @transform_7, window_bounds = array<i64: 512, 512>}, {pipeline_mode = #tpu.pipeline_mode<synchronous>, transform_indices = @transform_8, window_bounds = array<i64: 1, 512>}, {pipeline_mode = #tpu.pipeline_mode<synchronous>, transform_indices = @transform_9, window_bounds = array<i64: 512, 5>}, {pipeline_mode = #tpu.pipeline_mode<synchronous>, transform_indices = @transform_10, window_bounds = array<i64: 1, 5>}, {transform_indices = @transform_11, window_bounds = array<i64: 1, 1, 5>}]} {
    %c0 = arith.constant 0 : index
    %c0_0 = arith.constant 0 : index
    %c0_1 = arith.constant 0 : index
    %0 = vector.load %arg1[%c0, %c0_0, %c0_1] : memref<1x16x4xf32, #tpu.memory_space<vmem>>, vector<1x16x4xf32>
    %1 = vector.shape_cast %0 : vector<1x16x4xf32> to vector<16x4xf32>
    %c0_2 = arith.constant 0 : index
    %c0_3 = arith.constant 0 : index
    %2 = vector.load %arg2[%c0_2, %c0_3] : memref<12x64xf32, #tpu.memory_space<vmem>>, vector<12x64xf32>
    %c0_4 = arith.constant 0 : index
    %c0_5 = arith.constant 0 : index
    %3 = vector.load %arg3[%c0_4, %c0_5] : memref<1x64xf32, #tpu.memory_space<vmem>>, vector<1x64xf32>
    %cst = arith.constant 0.000000e+00 : f32
    %4 = vector.broadcast %cst : f32 to vector<1x4xf32>
    %5 = vector.extract_strided_slice %1 {offsets = [0, 0], sizes = [15, 4], strides = [1, 1]} : vector<16x4xf32> to vector<15x4xf32>
    %6 = tpu.concatenate %4, %5 in 0 : vector<1x4xf32>, vector<15x4xf32> -> vector<16x4xf32>
    %7 = vector.extract_strided_slice %1 {offsets = [1, 0], sizes = [15, 4], strides = [1, 1]} : vector<16x4xf32> to vector<15x4xf32>
    %8 = tpu.concatenate %7, %4 in 0 : vector<15x4xf32>, vector<1x4xf32> -> vector<16x4xf32>
    %9 = tpu.concatenate %6, %1, %8 in 1 : vector<16x4xf32>, vector<16x4xf32>, vector<16x4xf32> -> vector<16x12xf32>
    %cst_6 = arith.constant dense<0.000000e+00> : vector<16x64xf32>
    %10 = tpu.matmul %9, %2, %cst_6 {dimension_numbers = #tpu.dot_dimension_numbers<[1], [0], [0], [1], [0, 0, 1, 1], [], []>} : vector<16x12xf32>, vector<12x64xf32>, vector<16x64xf32> -> vector<16x64xf32>
    %11 = vector.broadcast %3 : vector<1x64xf32> to vector<16x64xf32>
    %12 = arith.addf %10, %11 : vector<16x64xf32>
    %cst_7 = arith.constant 0.000000e+00 : f32
    %13 = vector.broadcast %cst_7 : f32 to vector<16x64xf32>
    %14 = arith.maximumf %12, %13 : vector<16x64xf32>
    %15 = vector.shape_cast %14 : vector<16x64xf32> to vector<8x2x64xf32>
    %cst_8 = arith.constant dense<0xFF800000> : vector<8x64xf32>
    %16 = vector.multi_reduction <maximumf>, %15, %cst_8 [1] : vector<8x2x64xf32> to vector<8x64xf32>
    %c0_9 = arith.constant 0 : index
    %c0_10 = arith.constant 0 : index
    %17 = vector.load %arg4[%c0_9, %c0_10] : memref<192x128xf32, #tpu.memory_space<vmem>>, vector<192x128xf32>
    %c0_11 = arith.constant 0 : index
    %c0_12 = arith.constant 0 : index
    %18 = vector.load %arg5[%c0_11, %c0_12] : memref<1x128xf32, #tpu.memory_space<vmem>>, vector<1x128xf32>
    %cst_13 = arith.constant 0.000000e+00 : f32
    %19 = vector.broadcast %cst_13 : f32 to vector<1x64xf32>
    %20 = vector.extract_strided_slice %16 {offsets = [0, 0], sizes = [7, 64], strides = [1, 1]} : vector<8x64xf32> to vector<7x64xf32>
    %21 = tpu.concatenate %19, %20 in 0 : vector<1x64xf32>, vector<7x64xf32> -> vector<8x64xf32>
    %22 = vector.extract_strided_slice %16 {offsets = [1, 0], sizes = [7, 64], strides = [1, 1]} : vector<8x64xf32> to vector<7x64xf32>
    %23 = tpu.concatenate %22, %19 in 0 : vector<7x64xf32>, vector<1x64xf32> -> vector<8x64xf32>
    %24 = tpu.concatenate %21, %16, %23 in 1 : vector<8x64xf32>, vector<8x64xf32>, vector<8x64xf32> -> vector<8x192xf32>
    %cst_14 = arith.constant dense<0.000000e+00> : vector<8x128xf32>
    %25 = tpu.matmul %24, %17, %cst_14 {dimension_numbers = #tpu.dot_dimension_numbers<[1], [0], [0], [1], [0, 0, 1, 1], [], []>} : vector<8x192xf32>, vector<192x128xf32>, vector<8x128xf32> -> vector<8x128xf32>
    %26 = vector.broadcast %18 : vector<1x128xf32> to vector<8x128xf32>
    %27 = arith.addf %25, %26 : vector<8x128xf32>
    %cst_15 = arith.constant 0.000000e+00 : f32
    %28 = vector.broadcast %cst_15 : f32 to vector<8x128xf32>
    %29 = arith.maximumf %27, %28 : vector<8x128xf32>
    %30 = vector.shape_cast %29 : vector<8x128xf32> to vector<4x2x128xf32>
    %cst_16 = arith.constant dense<0xFF800000> : vector<4x128xf32>
    %31 = vector.multi_reduction <maximumf>, %30, %cst_16 [1] : vector<4x2x128xf32> to vector<4x128xf32>
    %c0_17 = arith.constant 0 : index
    %c0_18 = arith.constant 0 : index
    %32 = vector.load %arg6[%c0_17, %c0_18] : memref<384x256xf32, #tpu.memory_space<vmem>>, vector<384x256xf32>
    %c0_19 = arith.constant 0 : index
    %c0_20 = arith.constant 0 : index
    %33 = vector.load %arg7[%c0_19, %c0_20] : memref<1x256xf32, #tpu.memory_space<vmem>>, vector<1x256xf32>
    %cst_21 = arith.constant 0.000000e+00 : f32
    %34 = vector.broadcast %cst_21 : f32 to vector<1x128xf32>
    %35 = vector.extract_strided_slice %31 {offsets = [0, 0], sizes = [3, 128], strides = [1, 1]} : vector<4x128xf32> to vector<3x128xf32>
    %36 = tpu.concatenate %34, %35 in 0 : vector<1x128xf32>, vector<3x128xf32> -> vector<4x128xf32>
    %37 = vector.extract_strided_slice %31 {offsets = [1, 0], sizes = [3, 128], strides = [1, 1]} : vector<4x128xf32> to vector<3x128xf32>
    %38 = tpu.concatenate %37, %34 in 0 : vector<3x128xf32>, vector<1x128xf32> -> vector<4x128xf32>
    %39 = tpu.concatenate %36, %31, %38 in 1 : vector<4x128xf32>, vector<4x128xf32>, vector<4x128xf32> -> vector<4x384xf32>
    %cst_22 = arith.constant dense<0.000000e+00> : vector<4x256xf32>
    %40 = tpu.matmul %39, %32, %cst_22 {dimension_numbers = #tpu.dot_dimension_numbers<[1], [0], [0], [1], [0, 0, 1, 1], [], []>} : vector<4x384xf32>, vector<384x256xf32>, vector<4x256xf32> -> vector<4x256xf32>
    %41 = vector.broadcast %33 : vector<1x256xf32> to vector<4x256xf32>
    %42 = arith.addf %40, %41 : vector<4x256xf32>
    %cst_23 = arith.constant 0.000000e+00 : f32
    %43 = vector.broadcast %cst_23 : f32 to vector<4x256xf32>
    %44 = arith.maximumf %42, %43 : vector<4x256xf32>
    %45 = vector.shape_cast %44 : vector<4x256xf32> to vector<2x2x256xf32>
    %cst_24 = arith.constant dense<0xFF800000> : vector<2x256xf32>
    %46 = vector.multi_reduction <maximumf>, %45, %cst_24 [1] : vector<2x2x256xf32> to vector<2x256xf32>
    %47 = vector.extract_strided_slice %46 {offsets = [0, 0], sizes = [1, 256], strides = [1, 1]} : vector<2x256xf32> to vector<1x256xf32>
    %48 = vector.extract_strided_slice %46 {offsets = [1, 0], sizes = [1, 256], strides = [1, 1]} : vector<2x256xf32> to vector<1x256xf32>
    %49 = tpu.concatenate %47, %48 in 1 : vector<1x256xf32>, vector<1x256xf32> -> vector<1x512xf32>
    %c0_25 = arith.constant 0 : index
    %c0_26 = arith.constant 0 : index
    %50 = vector.load %arg8[%c0_25, %c0_26] : memref<512x512xf32, #tpu.memory_space<vmem>>, vector<512x512xf32>
    %cst_27 = arith.constant dense<0.000000e+00> : vector<1x512xf32>
    %51 = tpu.matmul %49, %50, %cst_27 {dimension_numbers = #tpu.dot_dimension_numbers<[1], [0], [0], [1], [0, 0, 1, 1], [], []>} : vector<1x512xf32>, vector<512x512xf32>, vector<1x512xf32> -> vector<1x512xf32>
    %c0_28 = arith.constant 0 : index
    %c0_29 = arith.constant 0 : index
    %52 = vector.load %arg9[%c0_28, %c0_29] : memref<1x512xf32, #tpu.memory_space<vmem>>, vector<1x512xf32>
    %53 = arith.addf %51, %52 : vector<1x512xf32>
    %cst_30 = arith.constant 0.000000e+00 : f32
    %54 = vector.broadcast %cst_30 : f32 to vector<1x512xf32>
    %55 = arith.maximumf %53, %54 : vector<1x512xf32>
    %c0_31 = arith.constant 0 : index
    %c0_32 = arith.constant 0 : index
    %56 = vector.load %arg10[%c0_31, %c0_32] : memref<512x5xf32, #tpu.memory_space<vmem>>, vector<512x5xf32>
    %cst_33 = arith.constant dense<0.000000e+00> : vector<1x5xf32>
    %57 = tpu.matmul %55, %56, %cst_33 {dimension_numbers = #tpu.dot_dimension_numbers<[1], [0], [0], [1], [0, 0, 1, 1], [], []>} : vector<1x512xf32>, vector<512x5xf32>, vector<1x5xf32> -> vector<1x5xf32>
    %c0_34 = arith.constant 0 : index
    %c0_35 = arith.constant 0 : index
    %58 = vector.load %arg11[%c0_34, %c0_35] : memref<1x5xf32, #tpu.memory_space<vmem>>, vector<1x5xf32>
    %59 = arith.addf %57, %58 : vector<1x5xf32>
    %cst_36 = arith.constant dense<0xFF800000> : vector<1xf32>
    %60 = vector.multi_reduction <maximumf>, %59, %cst_36 [1] : vector<1x5xf32> to vector<1xf32>
    %61 = vector.shape_cast %60 : vector<1xf32> to vector<1x1xf32>
    %62 = vector.broadcast %61 : vector<1x1xf32> to vector<1x5xf32>
    %63 = arith.subf %59, %62 : vector<1x5xf32>
    %64 = math.exp %63 : vector<1x5xf32>
    %cst_37 = arith.constant dense<0.000000e+00> : vector<1xf32>
    %65 = vector.multi_reduction <add>, %64, %cst_37 [1] : vector<1x5xf32> to vector<1xf32>
    %66 = vector.shape_cast %65 : vector<1xf32> to vector<1x1xf32>
    %67 = vector.broadcast %66 : vector<1x1xf32> to vector<1x5xf32>
    %68 = arith.divf %64, %67 : vector<1x5xf32>
    %c0_38 = arith.constant 0 : index
    %c0_39 = arith.constant 0 : index
    %c0_40 = arith.constant 0 : index
    %69 = vector.load %arg12[%c0_38, %c0_39, %c0_40] : memref<1x1x5xf32, #tpu.memory_space<vmem>>, vector<1x1x5xf32>
    %70 = vector.shape_cast %69 : vector<1x1x5xf32> to vector<1x5xf32>
    %71 = vector.shape_cast %68 : vector<1x5xf32> to vector<1x1x5xf32>
    tpu.vector_store %arg12[%c0_38, %c0_39, %c0_40], %71 {strides = array<i32>} : memref<1x1x5xf32, #tpu.memory_space<vmem>>, vector<1x1x5xf32>,
    return
  }
  func.func @transform_0(%arg0: i32) -> (i32, i32, i32) {
    %c0_i32 = arith.constant 0 : i32
    %c0_i32_0 = arith.constant 0 : i32
    %c0_i32_1 = arith.constant 0 : i32
    return %arg0, %c0_i32, %c0_i32_0 : i32, i32, i32
  }
  func.func @transform_1(%arg0: i32) -> (i32, i32) {
    %c0_i32 = arith.constant 0 : i32
    %c0_i32_0 = arith.constant 0 : i32
    %c0_i32_1 = arith.constant 0 : i32
    return %c0_i32, %c0_i32_0 : i32, i32
  }
  func.func @transform_2(%arg0: i32) -> (i32, i32) {
    %c0_i32 = arith.constant 0 : i32
    %c0_i32_0 = arith.constant 0 : i32
    %c0_i32_1 = arith.constant 0 : i32
    return %c0_i32, %c0_i32_0 : i32, i32
  }
  func.func @transform_3(%arg0: i32) -> (i32, i32) {
    %c0_i32 = arith.constant 0 : i32
    %c0_i32_0 = arith.constant 0 : i32
    %c0_i32_1 = arith.constant 0 : i32
    return %c0_i32, %c0_i32_0 : i32, i32
  }
  func.func @transform_4(%arg0: i32) -> (i32, i32) {
    %c0_i32 = arith.constant 0 : i32
    %c0_i32_0 = arith.constant 0 : i32
    %c0_i32_1 = arith.constant 0 : i32
    return %c0_i32, %c0_i32_0 : i32, i32
  }
  func.func @transform_5(%arg0: i32) -> (i32, i32) {
    %c0_i32 = arith.constant 0 : i32
    %c0_i32_0 = arith.constant 0 : i32
    %c0_i32_1 = arith.constant 0 : i32
    return %c0_i32, %c0_i32_0 : i32, i32
  }
  func.func @transform_6(%arg0: i32) -> (i32, i32) {
    %c0_i32 = arith.constant 0 : i32
    %c0_i32_0 = arith.constant 0 : i32
    %c0_i32_1 = arith.constant 0 : i32
    return %c0_i32, %c0_i32_0 : i32, i32
  }
  func.func @transform_7(%arg0: i32) -> (i32, i32) {
    %c0_i32 = arith.constant 0 : i32
    %c0_i32_0 = arith.constant 0 : i32
    %c0_i32_1 = arith.constant 0 : i32
    return %c0_i32, %c0_i32_0 : i32, i32
  }
  func.func @transform_8(%arg0: i32) -> (i32, i32) {
    %c0_i32 = arith.constant 0 : i32
    %c0_i32_0 = arith.constant 0 : i32
    %c0_i32_1 = arith.constant 0 : i32
    return %c0_i32, %c0_i32_0 : i32, i32
  }
  func.func @transform_9(%arg0: i32) -> (i32, i32) {
    %c0_i32 = arith.constant 0 : i32
    %c0_i32_0 = arith.constant 0 : i32
    %c0_i32_1 = arith.constant 0 : i32
    return %c0_i32, %c0_i32_0 : i32, i32
  }
  func.func @transform_10(%arg0: i32) -> (i32, i32) {
    %c0_i32 = arith.constant 0 : i32
    %c0_i32_0 = arith.constant 0 : i32
    %c0_i32_1 = arith.constant 0 : i32
    return %c0_i32, %c0_i32_0 : i32, i32
  }
  func.func @transform_11(%arg0: i32) -> (i32, i32, i32) {
    %c0_i32 = arith.constant 0 : i32
    %c0_i32_0 = arith.constant 0 : i32
    %c0_i32_1 = arith.constant 0 : i32
    return %arg0, %c0_i32, %c0_i32_0 : i32, i32, i32
  }
}

</mosaic_0001>

<bundles_post_ra>
// kernel: totem_forward.1
= control target key start
LH: loop header
LB: loop body
LE: loop exit
PB: predicated region body
PF: predicated region fallthrough
CT: control target
= control target key end

     0   :  { %16 = vsyncpa [#allocation3], 0  ;;  %s3465_s0 = inlined_call_operand.vmem [shape: f32[2,16,4], index: 0, kind: input, shape index: {}]   ;;  %s3466_s1 = inlined_call_operand.vmem [shape: f32[12,64], index: 1, kind: input, shape index: {}]   ;;  %s3467_s2 = inlined_call_operand.vmem [shape: f32[1,64], index: 2, kind: input, shape index: {}]   ;;  %s3468_s3 = inlined_call_operand.vmem [shape: f32[192,128], index: 3, kind: input, shape index: {}]   ;;  %s3469_s4 = inlined_call_operand.vmem [shape: f32[1,128], index: 4, kind: input, shape index: {}]   ;;  %s3470_s5 = inlined_call_operand.hbm [shape: f32[384,256], index: 5, kind: input, shape index: {}]   ;;  %s3471_s6 = inlined_call_operand.vmem [shape: f32[1,256], index: 6, kind: input, shape index: {}]   ;;  %s3472_s7 = inlined_call_operand.hbm [shape: f32[512,512], index: 7, kind: input, shape index: {}]   ;;  %s3473_s8 = inlined_call_operand.vmem [shape: f32[1,512], index: 8, kind: input, shape index: {}]   ;;  %s3474_s9 = inlined_call_operand.vmem [shape: f32[512,5], index: 9, kind: input, shape index: {}]   ;;  %s3475_s10 = inlined_call_operand.vmem [shape: f32[1,5], index: 10, kind: input, shape index: {}]   ;;  %s3476_s11 = inlined_call_operand.hbm [shape: f32[2,1,5], index: 11, kind: output, shape index: {}]  }
   0x1   :  { %17 = vsyncpa [#allocation6], 0 }
   0x2   :  { %18 = vsyncpa [#allocation4], 0 }
   0x3   :  { %20 = vsyncpa [#allocation4 + $0x1], 0  ;;  %s2900_s17 = smov 0   ;;  %s2902_s18 = smov 0  }
   0x4   :  { %s2904_s19 = smov 0   ;;  %s2906_s20 = smov 0  }
   0x5 LB: > { %3485 = sst [smem:[#allocation11_spill]] %s2812_s17  ;;  %s2921_s21 = sadd.s32 4294967295, %s2824_s20   ;;  %s2824_s20 = sphi %s2906_s20, %s3503_s20   ;;  %s2820_s19 = sphi %s2904_s19, %s3505_s19   ;;  %s2816_s18 = sphi %s2902_s18, %s3507_s18   ;;  %s2812_s17 = sphi %s2900_s17, %s3506_s17  }
   0x6   : > { %3486 = sst [smem:[#allocation12_spill]] %s2820_s19  ;;  %s2049_s22 = sadd.s32 4294967294, %s2824_s20  }
   0x7   : > { %s2925_s23 = sadd.s32 1, %s2824_s20   ;;  %s269_s24 = sadd.s32 1, %s2820_s19 }
   0x8   : > { %3487 = sst [smem:[#allocation13_spill]] %s2925_s23  ;;  %s266_s25 = ssub.s32 %s2824_s20, %s2925_s23 }
   0x9   : > { %p279_p0 = scmp.ne.s32.totalorder %s2820_s19, %s2816_s18  ;;  %p267_p1 = scmp.eq.s32.totalorder %s266_s25, 0 }
   0xa   : > { %p280_p2 = scmp.eq.s32.totalorder %s2921_s21, 1  ;;  %p285_p3 = scmp.ne.s32.totalorder %s2816_s18, %s2812_s17 }
   0xb   : > { %p286_p4 = scmp.eq.s32.totalorder %s2049_s22, 1  ;;  %p2050_p7 = scmp.ge.s32.totalorder %s2824_s20, 1 }
   0xc   : > { %s2936_s26 = scalar_select %p267_p1, %s2820_s19, %s269_s24  }
   0xd   : > { %p2938_p5 = por %p280_p2, %p279_p0  ;;  %p2942_p6 = por %p286_p4, %p285_p3 }
   0xe   : > { %3488 = sst [smem:[#allocation14_spill]] %s2936_s26  ;;  %p293_p8 = scmp.lt.s32.totalorder %s2824_s20, 3 }
   0xf   : > { %s3489_s27 = scalar_select %p2938_p5, 1, 0 }
  0x10   : > { %s3490_s28 = scalar_select %p2942_p6, 1, 0 }
  0x11   : > { %p3478_p9 = scmp.eq.s32.totalorder %s2921_s21, 0  ;;  %p2949_p10 = pnand %p2050_p7, %p293_p8 }
  0x12   : > { %3491 = sst [smem:[#allocation15_spill]] %s3490_s28  ;;  %s2826_s30 = smov [#allocation2]  }
  0x13   : > { %s3492_s29 = scalar_select %p2949_p10, 1, 0 }
  0x14   : > { %s317_s12 = sshll.u32 %s2826_s30, 4  ;;  %p2633_p11 = pneg %p2949_p10  ;;  %s318_s12 = int_to_ptr.vmem [resolvable:$true] %s317_s12 }
  0x15   : > { %s2827_s14 = smov [#allocation5]   ;;  %s2698_s24 = scalar_lea.hbm %s3470_s5, 12288 }
  0x16   : > { %p2957_p12 = pnand %p3478_p9, %p2633_p11  ;;  %s333_s15 = sshll.u32 %s2827_s14, 4  ;;  %s2961_s15 = int_to_ptr.vmem [resolvable:$true] %s333_s15 }
  0x17   : > { %p2699_p13 = scmp.ne.s32.totalorder %s3470_s5, %s2698_s24  ;;  %p2705_p3 = scmp.lt.u32.totalorder %s2698_s24, %s3470_s5 }
  0x18   : > { %p2700_p0 = pneg %p2957_p12 }
  0x1a   : > { %p2701_p1 = pnand %p2700_p0, %p2699_p13 }
  0x1c   : > { %p2702_p2 = pneg %p2701_p1 }
  0x1e   : > { %p2707_p4 = pnand %p2705_p3, %p2702_p2 }
  0x20   : > { %2710 = shalt.err (!%p2707_p4)
}
  0x21   : > { %s2711_s14 = scalar_lea.vmem %s318_s12, 12288  ;;  %p2719_p9 = scmp.lt.s32.totalorder %s318_s12, %s318_s12 }
  0x22   : > { %p2712_p7 = scmp.ne.s32.totalorder %s318_s12, %s2711_s14  ;;  %p2720_p6 = scmp.lt.s32.totalorder %s2711_s14, %s2711_s14 }
  0x24   : > { %p2714_p8 = pnand %p2712_p7, %p2700_p0  ;;  %p2721_p5 = por %p2720_p6, %p2719_p9 }
  0x26   : > { %p2715_p11 = pneg %p2714_p8 }
  0x28   : > { %p2722_p10 = pnand %p2721_p5, %p2715_p11 }
  0x2a   : > { %2725 = shalt.err (!%p2722_p10)
}
  0x2b   : > { %s2828_s16 = smov 256   ;;  %s2829_s22 = smov 16  }
  0x2c   : > { %2636 = dma.hbm_to_vmem [thread:$0]  (!%p2957_p12), %s3470_s5, 12288, %s318_s12, [#allocation3], %s2828_s16, %s2828_s16, %s2829_s22  }
  0x2d   : > { %s2726_s30 = scalar_lea.hbm %s3472_s7, 32768 }
  0x2e   : > { %p2727_p13 = scmp.ne.s32.totalorder %s3472_s7, %s2726_s30  ;;  %p2733_p9 = scmp.lt.u32.totalorder %s2726_s30, %s3472_s7 }
  0x30   : > { %p2729_p5 = pnand %p2727_p13, %p2700_p0 }
  0x32   : > { %p2730_p6 = pneg %p2729_p5 }
  0x34   : > { %p2735_p10 = pnand %p2733_p9, %p2730_p6 }
  0x36   : > { %2738 = shalt.err (!%p2735_p10)
}
  0x37   : > { %s2739_s12 = scalar_lea.vmem %s2961_s15, 32768  ;;  %p2747_p4 = scmp.lt.s32.totalorder %s2961_s15, %s2961_s15 }
  0x38   : > { %p2740_p1 = scmp.ne.s32.totalorder %s2961_s15, %s2739_s12  ;;  %p2748_p7 = scmp.lt.s32.totalorder %s2739_s12, %s2739_s12 }
  0x3a   : > { %p2742_p2 = pnand %p2740_p1, %p2700_p0  ;;  %p2749_p8 = por %p2748_p7, %p2747_p4 }
  0x3c   : > { %p2743_p3 = pneg %p2742_p2 }
  0x3e   : > { %p2750_p11 = pnand %p2749_p8, %p2743_p3 }
  0x40   : > { %2753 = shalt.err (!%p2750_p11)
}
  0x41   : > { %s2830_s17 = smov 512   ;;  %s2831_s23 = smov 32  }
  0x42   : > { %2639 = dma.hbm_to_vmem [thread:$0]  (!%p2957_p12), %s3472_s7, 32768, %s2961_s15, [#allocation6], %s2830_s17, %s2830_s17, %s2831_s23  }
  0x43   : > { %p3494_p13 = scmp.ne.s32.totalorder %s3492_s29, 0 }
  0x44   : > { %p3495_p0 = scmp.eq.s32.totalorder (!%p3494_p13), %s2921_s21, 0 }
  0x45   : > { %366 = sbr.rel (%p3494_p13) target bundleno = 1936 (0x790), region = 64 }
  0x4c   : > { %2799 = dma.done.wait (%p3495_p0), [#allocation3], 12288   ;;  %p3496_p5 = pmov %p3495_p0 }
  0x4d   : > { %p3497_p6 = pmov %p3495_p0 }
  0x4e   : > { %2801 = vsyncadd (%p3496_p5), [#allocation3], 4294955008 }
  0x4f   : > { %2803 = dma.done.wait (%p3497_p6), [#allocation6], 32768   ;;  %p3498_p9 = pmov %p3495_p0 }
  0x50   : > { %p409_p10 = scmp.lt.s32.totalorder %s2921_s21, 1  ;;  %vm466_vm0 = vcmask 1043456   ;;  %vm428_vm1 = vcmask 1046528   ;;  %v416_v2 = vld [vmem:[%s3466_s1] sm:$0xff]  ;;  %s2832_s25 = smov 4   ;;  %vm2833_vm2 = vmmov 1   ;;  %v553_v60 = vlaneseq }
  0x51   : > { %2805 = vsyncadd (%p3498_p9), [#allocation6], 4294934528  ;;  %v417_v7 = vld [vmem:[%s3466_s1 + $0x8] sm:$0xf]  ;;  %vm421_vm4 = vcmask 1040384   ;;  %s2834_s12 = smov 8  }
  0x52   : > { %s410_s13 = scalar_select %p409_p10, %s2921_s21, 1  ;;  %vm2154_vm3 = vmpackc.low %vm466_vm0, %vm2833_vm2  ;;  %v2153_v8 = vpack.c.bf16 %v417_v7, %v416_v2  ;;  %vm447_vm5 = vcmask 31744   ;;  %vm450_vm6 = vcmask 64512   ;;  %vm459_vm7 = vcmask 97280   ;;  %v648_v21 = vld [vmem:[%s3468_s3] sm:$0xff]  ;;  %v649_v22 = vld [vmem:[%s3468_s3 + $0x8] sm:$0xff] }
  0x53   : > { %v650_v23 = vld [vmem:[%s3468_s3 + $0x10] sm:$0xff]  ;;  %v2835_v24 = vmov 0.0|0.0   ;;  %v2160_v25 = vpack.c.bf16 %v649_v22, %v648_v21  ;;  %v651_v26 = vld [vmem:[%s3468_s3 + $0x18] sm:$0xff]  ;;  %v652_v28 = vld [vmem:[%s3468_s3 + $0x20] sm:$0xff]  ;;  %v2836_v58 = vmov 1983009808  }
  0x54   : > { %s2071_s15 = sshll.u32 %s410_s13, 4  ;;  %2155 = vmatprep.subr.msk.bf16.mxu0 %vm2154_vm3, %v2153_v8  ;;  %2159 = vmatprep.subr.bf16.mxu1 %v2835_v24  ;;  %v2163_v27 = vpack.c.bf16 %v651_v26, %v650_v23  ;;  %v653_v29 = vld [vmem:[%s3468_s3 + $0x28] sm:$0xff]  ;;  %v654_v31 = vld [vmem:[%s3468_s3 + $0x30] sm:$0xff]  ;;  %v655_v32 = vld [vmem:[%s3468_s3 + $0x38] sm:$0xff]  ;;  %v551_v59 = vunpack.c.l.s4 %v2836_v58  ;;  %v3107_v62 = vshrl.u32 %v553_v60, 7  ;;  %vm591_vm8 = vcmask 517120  }
  0x55   : > { %s413_s19 = scalar_lea.vmem %s3465_s0, %s2071_s15  ;;  %2158 = vmatpush3.bf16.msk.msra.mxu0 %vm2154_vm3, %v2153_v8  ;;  %2161 = vmatpush1.bf16.msra.mxu1 %v2160_v25  ;;  %v2166_v30 = vpack.c.bf16 %v653_v29, %v652_v28  ;;  %v2169_v33 = vpack.c.bf16 %v655_v32, %v654_v31  ;;  %v656_v34 = vld [vmem:[%s3468_s3 + $0x40] sm:$0xff]  ;;  %v657_v35 = vld [vmem:[%s3468_s3 + $0x48] sm:$0xff]  ;;  %v658_v37 = vld [vmem:[%s3468_s3 + $0x50] sm:$0xff]  ;;  %vm680_vm9 = vcmask 1042434   ;;  %vm695_vm10 = vcmask 1041409   ;;  %s2837_s15 = smov 64  }
  0x56   : > { %v414_v0 = vld [vmem:[%s413_s19] sm:$0xff]  ;;  %v415_v1 = vld [vmem:[%s413_s19 + $0x8] sm:$0xff]  ;;  %2162 = vmatprep.subr.bf16.mxu1 %v2835_v24  ;;  %v2172_v36 = vpack.c.bf16 %v657_v35, %v656_v34  ;;  %v659_v38 = vld [vmem:[%s3468_s3 + $0x58] sm:$0xff]  ;;  %v552_v61 = vunpack.c.0.s8 %v551_v59  ;;  %vm682_vm11 = vcmask 1043459   ;;  %vm684_vm12 = vcmask 1044484   ;;  %s407_s29 = sand.u32 1, %s2816_s18  }
  0x57   : > { %v423_v3 = vrot.slane %v415_v1, 7  ;;  %434 = vrot.lane.b32.xlu0 %v414_v0, %s2832_s25  ;;  %v422_v4 = vrot.slane %v414_v0, 7  ;;  %v429_v5 = vrot.slane %v414_v0, 1  ;;  %v430_v6 = vrot.slane %v415_v1, 1  ;;  %v660_v40 = vld [vmem:[%s3468_s3 + $0x60] sm:$0xff]  ;;  %v661_v41 = vld [vmem:[%s3468_s3 + $0x68] sm:$0xff]  ;;  %vm2065_vm2 = vmneg %vm421_vm4 }
  0x58   : > { %v2175_v39 = vpack.c.bf16 %v659_v38, %v658_v37  ;;  %v2178_v42 = vpack.c.bf16 %v661_v41, %v660_v40  ;;  %v662_v43 = vld [vmem:[%s3468_s3 + $0x70] sm:$0xff]  ;;  %v663_v44 = vld [vmem:[%s3468_s3 + $0x78] sm:$0xff]  ;;  %v664_v46 = vld [vmem:[%s3468_s3 + $0x80] sm:$0xff]  ;;  %v3113_v2 = vsub.s32 %v552_v61, %v3107_v62  ;;  %vm686_vm13 = vcmask 1045509   ;;  %s2068_s19 = sshll.u32 %s2921_s21, 4  ;;  %s408_s26 = scalar_lea.vmem [#allocation7], %s407_s29 }
  0x59   : > { %v431_v9 = vsel %vm428_vm1, %v429_v5, %v430_v6  ;;  %v424_v10 = vsel %vm421_vm4, %v422_v4, %v423_v3  ;;  %v433_v11 = vsel %vm428_vm1, %v430_v6, 0.0  ;;  %v427_v12 = vsel %vm421_vm4, 0.0, %v422_v4  ;;  %2164 = vmatpush1.bf16.msra.mxu1 %v2163_v27  ;;  %v665_v47 = vld [vmem:[%s3468_s3 + $0x88] sm:$0xff]  ;;  %v666_v49 = vld [vmem:[%s3468_s3 + $0x90] sm:$0xff]  ;;  %v667_v50 = vld [vmem:[%s3468_s3 + $0x98] sm:$0xff]  ;;  %s1972_s24 = sshll.u32 %s408_s26, 4  ;;  %s3422_s14 = scalar_lea.hbm %s3476_s11, %s2068_s19  ;;  %s3424_s24 = int_to_ptr.vmem [resolvable:$true] %s1972_s24 }
  0x5a   : > { %441 = vrot.lane.b32.xlu1 %v431_v9, %s2834_s12  ;;  %2165 = vmatprep.subr.bf16.mxu1 %v2835_v24  ;;  %v2181_v45 = vpack.c.bf16 %v663_v44, %v662_v43  ;;  %v2184_v48 = vpack.c.bf16 %v665_v47, %v664_v46  ;;  %v2187_v51 = vpack.c.bf16 %v667_v50, %v666_v49  ;;  %v668_v52 = vld [vmem:[%s3468_s3 + $0xa0] sm:$0xff]  ;;  %v669_v53 = vld [vmem:[%s3468_s3 + $0xa8] sm:$0xff]  ;;  %v670_v55 = vld [vmem:[%s3468_s3 + $0xb0] sm:$0xff]  ;;  %vm688_vm14 = vcmask 1046534   ;;  %s2754_s17 = scalar_lea.vmem %s3424_s24, 16  ;;  %p3499_p1 = scmp.ne.s32.totalorder %s3489_s27, 0 }
  0x5b   : > { %436 = vrot.lane.b32.xlu0 %v415_v1, %s2832_s25  ;;  %v2190_v54 = vpack.c.bf16 %v669_v53, %v668_v52  ;;  %v671_v56 = vld [vmem:[%s3468_s3 + $0xb8] sm:$0xff]  ;;  %v2059_v63 = vld [vmem:[%s3467_s2] ss:$0 sm:$0xff]  ;;  %v848_v59 = vld [vmem:[#allocation2 + $0x8] sm:$0xff]  ;;  %vm690_vm15 = vcmask 1047559   ;;  %vm714_vm0 = vcmask 523264   ;;  %p2755_p12 = scmp.ne.s32.totalorder %s3424_s24, %s2754_s17 }
  0x5c   : > { %v2193_v57 = vpack.c.bf16 %v671_v56, %v670_v55  ;;  %v850_v60 = vld [vmem:[#allocation2 + $0x18] sm:$0xff]  ;;  %v847_v61 = vld [vmem:[#allocation2] sm:$0xff]  ;;  %vm955_vm3 = vcmask 1042432   ;;  %s2839_s21 = smov [#allocation7]  }
  0x5d   : > { %2167 = vmatpush1.bf16.msra.mxu1 %v2166_v30  ;;  %p2756_p2 = pnand %p2755_p12, %p3499_p1  ;;  %s2758_s23 = sshll.u32 %s2839_s21, 4  ;;  %s2759_s23 = int_to_ptr.vmem [resolvable:$false] %s2758_s23 }
  0x5e   : > { %443 = vrot.lane.b32.xlu1 %v433_v11, %s2834_s12  ;;  %2168 = vmatprep.subr.bf16.mxu1 %v2835_v24  ;;  %s1960_s12 = scalar_lea.sflag [#allocation4], %s407_s29  ;;  %s2760_s28 = scalar_lea.vmem %s2759_s23, 32 }
  0x5f   : > { %p2757_p3 = pneg %p2756_p2  ;;  %p2761_p4 = scmp.lt.s32.totalorder %s3424_s24, %s2759_s23 }
  0x60   : > { %p2762_p7 = scmp.lt.s32.totalorder %s2760_s28, %s2754_s17 }
  0x61   : > { %2170 = vmatpush1.bf16.msra.mxu1 %v2169_v33 }
  0x62   : > { %2171 = vmatprep.subr.bf16.mxu1 %v2835_v24  ;;  %p2763_p8 = por %p2762_p7, %p2761_p4 }
  0x64   : > { %p2764_p11 = pnand %p2763_p8, %p2757_p3 }
  0x65   : > { %2173 = vmatpush1.bf16.msra.mxu1 %v2172_v36 }
  0x66   : > { %2174 = vmatprep.subr.bf16.mxu1 %v2835_v24 }
  0x69   : > { %2176 = vmatpush1.bf16.msra.mxu1 %v2175_v39 }
  0x6a   : > { %2177 = vmatprep.subr.bf16.mxu1 %v2835_v24 }
  0x6d   : > { %2179 = vmatpush1.bf16.msra.mxu1 %v2178_v42 }
  0x6e   : > { %2180 = vmatprep.subr.bf16.mxu1 %v2835_v24 }
  0x71   : > { %2182 = vmatpush1.bf16.msra.mxu1 %v2181_v45 }
  0x72   : > { %2183 = vmatprep.subr.bf16.mxu1 %v2835_v24 }
  0x75   : > { %2185 = vmatpush1.bf16.msra.mxu1 %v2184_v48 }
  0x76   : > { %2186 = vmatprep.subr.bf16.mxu1 %v2835_v24 }
  0x79   : > { %2188 = vmatpush1.bf16.msra.mxu1 %v2187_v51 }
  0x7a   : > { %2189 = vmatprep.subr.bf16.mxu1 %v2835_v24 }
  0x7d   : > { %2191 = vmatpush1.bf16.msra.mxu1 %v2190_v54 }
  0x7e   : > { %2192 = vmatprep.subr.bf16.mxu1 %v2835_v24 }
  0x81   : > { %2194 = vmatpush1.bf16.msra.mxu1 %v2193_v57 }
  0xc9   : > { %v435_v13 = vpop.permute.xlu0 %434 }
  0xca   : > { %v448_v14 = vsel %vm447_vm5, %v427_v12, %v435_v13 }
  0xcc   : > { %v442_v15 = vpop.permute.xlu1 %441 }
  0xcd   : > { %v451_v16 = vsel %vm450_vm6, %v448_v14, %v442_v15  ;;  %v437_v17 = vpop.permute.xlu0 %436 }
  0xce   : > { %2150 = vmatprep.mubr.msk.f32.mxu0 %vm459_vm7, %v451_v16  ;;  %v449_v18 = vsel %vm447_vm5, %v424_v10, %v437_v17 }
  0xd0   : > { %v444_v19 = vpop.permute.xlu1 %443 }
  0xd1   : > { %v452_v20 = vsel %vm450_vm6, %v449_v18, %v444_v19 }
  0xd2   : > { %2151 = vmatmul.mubr.msk.f32.vlgmr.msra.gmra.mrb[0].mxu0 %vm459_vm7, %v452_v20 }
 0x1a5   : > { %v2152_v0 = vpop.f32.mrb[0].mxu0 }
 0x1a6   : > { %v542_v1 = vadd.f32 %v2152_v0, %v2059_v63  ;;  %v536_v3 = vpop.f32.mrb[1].mxu0 }
 0x1a7   : > { %v537_v4 = vadd.f32 %v2059_v63, %v536_v3  ;;  %v2195_v3 = vpack.c.bf16 %v850_v60, %v848_v59  ;;  %v865_v59 = vld [vmem:[#allocation2 + $0x90] sm:$0xff]  ;;  %v868_v60 = vld [vmem:[#allocation2 + $0xa8] sm:$0xff] }
 0x1a8   : > { %v546_v5 = vmax.f32 %v542_v1, 0.0 }
 0x1a9   : > { %v545_v6 = vmax.f32 %v537_v4, 0.0  ;;  %v849_v4 = vld [vmem:[#allocation2 + $0x10] sm:$0xff]  ;;  %2196 = vmatprep.subr.bf16.mxu0 %v2195_v3 }
 0x1aa   : > { %v566_v7 = vcombine.high %v546_v5, %v546_v5  ;;  %v573_v8 = vrot.slane %v546_v5, %v3113_v2  ;;  %v852_v5 = vld [vmem:[#allocation2 + $0x28] sm:$0xff]  ;;  %v869_v3 = vld [vmem:[#allocation2 + $0xb0] sm:$0xff] }
 0x1ab   : > { %v549_v9 = vcombine.high %v545_v6, %v545_v6  ;;  %v556_v10 = vrot.slane %v545_v6, %v3113_v2  ;;  %v854_v6 = vld [vmem:[#allocation2 + $0x38] sm:$0xff] }
 0x1ac   : > { %v580_v11 = vrot.slane %v566_v7, %v3113_v2  ;;  %v581_v12 = vcombine.high %v573_v8, %v573_v8  ;;  %v620_v13 = vsel %vm591_vm8, %v573_v8, -inf }
 0x1ad   : > { %v621_v14 = vrot.slane %v620_v13, 4  ;;  %v563_v15 = vrot.slane %v549_v9, %v3113_v2  ;;  %v564_v16 = vcombine.high %v556_v10, %v556_v10  ;;  %v592_v17 = vsel %vm591_vm8, %v556_v10, -inf }
 0x1ae   : > { %v582_v18 = vcombine.high %v580_v11, %v580_v11  ;;  %v627_v19 = vsel %vm591_vm8, %v581_v12, -inf  ;;  %v634_v20 = vsel %vm591_vm8, %v580_v11, -inf  ;;  %v593_v21 = vrot.slane %v592_v17, 4  ;;  %v851_v11 = vld [vmem:[#allocation2 + $0x20] sm:$0xff]  ;;  %v853_v12 = vld [vmem:[#allocation2 + $0x30] sm:$0xff] }
 0x1af   : > { %v622_v22 = vmax.f32 %v620_v13, %v621_v14  ;;  %v628_v23 = vrot.slane %v627_v19, 4  ;;  %v635_v24 = vrot.slane %v634_v20, 4  ;;  %v565_v25 = vcombine.high %v563_v15, %v563_v15  ;;  %v856_v13 = vld [vmem:[#allocation2 + $0x48] sm:$0xff] }
 0x1b0   : > { %v641_v26 = vsel %vm591_vm8, %v582_v18, -inf  ;;  %v594_v27 = vmax.f32 %v592_v17, %v593_v21  ;;  %v599_v28 = vsel %vm591_vm8, %v564_v16, -inf  ;;  %v606_v29 = vsel %vm591_vm8, %v563_v15, -inf  ;;  %v858_v18 = vld [vmem:[#allocation2 + $0x58] sm:$0xff] }
 0x1b1   : > { %v623_v30 = vrot.slane %v622_v22, 2  ;;  %v629_v31 = vmax.f32 %v627_v19, %v628_v23  ;;  %v636_v32 = vmax.f32 %v634_v20, %v635_v24  ;;  %v642_v33 = vrot.slane %v641_v26, 4 }
 0x1b2   : > { %v595_v34 = vrot.slane %v594_v27, 2  ;;  %v600_v35 = vrot.slane %v599_v28, 4  ;;  %v607_v36 = vrot.slane %v606_v29, 4  ;;  %v613_v37 = vsel %vm591_vm8, %v565_v25, -inf }
 0x1b3   : > { %v630_v38 = vrot.slane %v629_v31, 2  ;;  %v637_v39 = vrot.slane %v636_v32, 2  ;;  %v643_v40 = vmax.f32 %v641_v26, %v642_v33  ;;  %v614_v44 = vrot.slane %v613_v37, 4  ;;  %v855_v26 = vld [vmem:[#allocation2 + $0x40] sm:$0xff]  ;;  %v862_v33 = vld [vmem:[#allocation2 + $0x78] sm:$0xff] }
 0x1b4   : > { %v596_v41 = vmax.f32 %v594_v27, %v595_v34  ;;  %v601_v42 = vmax.f32 %v599_v28, %v600_v35  ;;  %v608_v43 = vmax.f32 %v606_v29, %v607_v36  ;;  %v624_v45 = vmax.f32 %v622_v22, %v623_v30  ;;  %v857_v27 = vld [vmem:[#allocation2 + $0x50] sm:$0xff] }
 0x1b5   : > { %v631_v46 = vmax.f32 %v629_v31, %v630_v38  ;;  %v644_v47 = vrot.slane %v643_v40, 2  ;;  %v615_v50 = vmax.f32 %v613_v37, %v614_v44  ;;  %v638_v51 = vmax.f32 %v636_v32, %v637_v39  ;;  %v860_v32 = vld [vmem:[#allocation2 + $0x68] sm:$0xff] }
 0x1b6   : > { %v602_v48 = vrot.slane %v601_v42, 2  ;;  %v609_v49 = vrot.slane %v608_v43, 2  ;;  %v597_v52 = vrot.slane %v596_v41, 1  ;;  %v625_v57 = vrot.slane %v624_v45, 1 }
 0x1b7   : > { %v616_v55 = vrot.slane %v615_v50, 2  ;;  %v645_v56 = vmax.f32 %v643_v40, %v644_v47  ;;  %v632_v58 = vrot.slane %v631_v46, 1  ;;  %v639_v8 = vrot.slane %v638_v51, 1  ;;  %v861_v47 = vld [vmem:[#allocation2 + $0x70] sm:$0xff] }
 0x1b8   : > { %v603_v53 = vmax.f32 %v601_v42, %v602_v48  ;;  %v610_v54 = vmax.f32 %v608_v43, %v609_v49  ;;  %v598_v7 = vmax.f32 %v596_v41, %v597_v52  ;;  %v2197_v9 = vpack.c.bf16 %v849_v4, %v847_v61  ;;  %v866_v52 = vld [vmem:[#allocation2 + $0x98] sm:$0xff]  ;;  %v872_v4 = vld [vmem:[#allocation2 + $0xc8] sm:$0xff] }
 0x1b9   : > { %v617_v1 = vmax.f32 %v615_v50, %v616_v55  ;;  %v2199_v10 = vpack.c.bf16 %v854_v6, %v852_v5  ;;  %v646_v17 = vrot.slane %v645_v56, 1  ;;  %v626_v19 = vmax.f32 %v624_v45, %v625_v57  ;;  %v870_v61 = vld [vmem:[#allocation2 + $0xb8] sm:$0xff] }
 0x1ba   : > { %v604_v63 = vrot.slane %v603_v53, 1  ;;  %v611_v0 = vrot.slane %v610_v54, 1  ;;  %2198 = vmatpush1.bf16.msra.mxu0 %v2197_v9  ;;  %v2201_v20 = vpack.c.bf16 %v853_v12, %v851_v11  ;;  %v2203_v21 = vpack.c.bf16 %v858_v18, %v856_v13  ;;  %v874_v5 = vld [vmem:[#allocation2 + $0xd8] sm:$0xff]  ;;  %v873_v9 = vld [vmem:[#allocation2 + $0xd0] sm:$0xff] }
 0x1bb   : > { %v618_v16 = vrot.slane %v617_v1, 1  ;;  %2200 = vmatprep.subr.bf16.mxu0 %v2199_v10  ;;  %v633_v28 = vmax.f32 %v631_v46, %v632_v58  ;;  %v640_v29 = vmax.f32 %v638_v51, %v639_v8  ;;  %v647_v34 = vmax.f32 %v645_v56, %v646_v17  ;;  %v859_v46 = vld [vmem:[#allocation2 + $0x60] sm:$0xff]  ;;  %v864_v51 = vld [vmem:[#allocation2 + $0x88] sm:$0xff]  ;;  %v878_v11 = vld [vmem:[#allocation2 + $0xf8] sm:$0xff] }
 0x1bc   : > { %v605_v14 = vmax.f32 %v603_v53, %v604_v63  ;;  %v612_v15 = vmax.f32 %v610_v54, %v611_v0  ;;  %v2205_v41 = vpack.c.bf16 %v857_v27, %v855_v26  ;;  %v2207_v45 = vpack.c.bf16 %v862_v33, %v860_v32  ;;  %v863_v58 = vld [vmem:[#allocation2 + $0x80] sm:$0xff]  ;;  %v876_v10 = vld [vmem:[#allocation2 + $0xe8] sm:$0xff]  ;;  %v882_v17 = vld [vmem:[#allocation2 + $0x118] sm:$0xff] }
 0x1bd   : > { %v619_v22 = vmax.f32 %v617_v1, %v618_v16  ;;  %v2209_v56 = vpack.c.bf16 %v861_v47, %v859_v46  ;;  %v2211_v57 = vpack.c.bf16 %v866_v52, %v864_v51  ;;  %v2213_v63 = vpack.c.bf16 %v865_v59, %v863_v58  ;;  %v867_v1 = vld [vmem:[#allocation2 + $0xa0] sm:$0xff]  ;;  %v880_v16 = vld [vmem:[#allocation2 + $0x108] sm:$0xff]  ;;  %v885_v27 = vld [vmem:[#allocation2 + $0x130] sm:$0xff] }
 0x1be   : > { %v681_v23 = vsel %vm680_vm9, %v605_v14, %v598_v7  ;;  %v704_v24 = vsel %vm695_vm10, %v605_v14, %v598_v7  ;;  %v696_v25 = vsel %vm695_vm10, %v612_v15, %v605_v14  ;;  %2202 = vmatpush1.bf16.msra.mxu0 %v2201_v20  ;;  %v2215_v0 = vpack.c.bf16 %v870_v61, %v868_v60  ;;  %v871_v8 = vld [vmem:[#allocation2 + $0xc0] sm:$0xff]  ;;  %v888_v32 = vld [vmem:[#allocation2 + $0x148] sm:$0xff]  ;;  %v890_v33 = vld [vmem:[#allocation2 + $0x158] sm:$0xff] }
 0x1bf   : > { %v705_v30 = vsel %vm680_vm9, %v612_v15, %v704_v24  ;;  %v683_v31 = vsel %vm682_vm11, %v612_v15, %v681_v23  ;;  %v697_v36 = vsel %vm680_vm9, %v619_v22, %v696_v25  ;;  %2204 = vmatprep.subr.bf16.mxu0 %v2203_v21  ;;  %v2217_v6 = vpack.c.bf16 %v869_v3, %v867_v1  ;;  %v875_v14 = vld [vmem:[#allocation2 + $0xe0] sm:$0xff]  ;;  %v877_v15 = vld [vmem:[#allocation2 + $0xf0] sm:$0xff]  ;;  %v886_v23 = vld [vmem:[#allocation2 + $0x138] sm:$0xff] }
 0x1c0   : > { %v706_v35 = vsel %vm682_vm11, %v619_v22, %v705_v30  ;;  %v685_v37 = vsel %vm684_vm12, %v619_v22, %v683_v31  ;;  %v698_v39 = vsel %vm682_vm11, %v626_v19, %v697_v36  ;;  %v2219_v7 = vpack.c.bf16 %v874_v5, %v872_v4  ;;  %v879_v20 = vld [vmem:[#allocation2 + $0x100] sm:$0xff]  ;;  %v881_v21 = vld [vmem:[#allocation2 + $0x110] sm:$0xff]  ;;  %v884_v22 = vld [vmem:[#allocation2 + $0x128] sm:$0xff] }
 0x1c1   : > { %v707_v38 = vsel %vm684_vm12, %v626_v19, %v706_v35  ;;  %v687_v40 = vsel %vm686_vm13, %v626_v19, %v685_v37  ;;  %v699_v43 = vsel %vm684_vm12, %v633_v28, %v698_v39  ;;  %v2221_v12 = vpack.c.bf16 %v873_v9, %v871_v8  ;;  %v883_v26 = vld [vmem:[#allocation2 + $0x120] sm:$0xff]  ;;  %v889_v36 = vld [vmem:[#allocation2 + $0x150] sm:$0xff]  ;;  %v894_v39 = vld [vmem:[#allocation2 + $0x178] sm:$0xff] }
 0x1c2   : > { %v708_v42 = vsel %vm686_vm13, %v633_v28, %v707_v38  ;;  %v689_v44 = vsel %vm688_vm14, %v633_v28, %v687_v40  ;;  %v700_v49 = vsel %vm686_vm13, %v640_v29, %v699_v43  ;;  %2206 = vmatpush1.bf16.msra.mxu0 %v2205_v41  ;;  %v2223_v13 = vpack.c.bf16 %v878_v11, %v876_v10  ;;  %v887_v35 = vld [vmem:[#allocation2 + $0x140] sm:$0xff]  ;;  %v892_v38 = vld [vmem:[#allocation2 + $0x168] sm:$0xff]  ;;  %v902_v51 = vld [vmem:[#allocation2 + $0x1b8] sm:$0xff] }
 0x1c3   : > { %v709_v48 = vsel %vm688_vm14, %v640_v29, %v708_v42  ;;  %v691_v50 = vsel %vm690_vm15, %v640_v29, %v689_v44  ;;  %v701_v54 = vsel %vm688_vm14, %v647_v34, %v700_v49  ;;  %2208 = vmatprep.subr.bf16.mxu0 %v2207_v45  ;;  %v2225_v18 = vpack.c.bf16 %v877_v15, %v875_v14  ;;  %v891_v41 = vld [vmem:[#allocation2 + $0x160] sm:$0xff]  ;;  %v893_v42 = vld [vmem:[#allocation2 + $0x170] sm:$0xff]  ;;  %v896_v44 = vld [vmem:[#allocation2 + $0x188] sm:$0xff] }
 0x1c4   : > { %v710_v53 = vsel %vm690_vm15, %v647_v34, %v709_v48  ;;  %v703_v55 = vsel %vm428_vm1, %v701_v54, 0.0  ;;  %v2227_v19 = vpack.c.bf16 %v882_v17, %v880_v16  ;;  %v2229_v24 = vpack.c.bf16 %v881_v21, %v879_v20  ;;  %v898_v45 = vld [vmem:[#allocation2 + $0x198] sm:$0xff]  ;;  %v895_v47 = vld [vmem:[#allocation2 + $0x180] sm:$0xff]  ;;  %v897_v48 = vld [vmem:[#allocation2 + $0x190] sm:$0xff] }
 0x1c5   : > { %711 = vrot.lane.b32.xlu0 %v710_v53, %s2837_s15  ;;  %2064 = vmatprep.mubr.msk.f32.mxu1 %vm714_vm0, %v703_v55  ;;  %v2231_v25 = vpack.c.bf16 %v886_v23, %v884_v22  ;;  %v2233_v28 = vpack.c.bf16 %v885_v27, %v883_v26  ;;  %v693_v30 = vsel %vm421_vm4, 0.0, %v691_v50  ;;  %v2235_v34 = vpack.c.bf16 %v890_v33, %v888_v32  ;;  %v900_v50 = vld [vmem:[#allocation2 + $0x1a8] sm:$0xff]  ;;  %v899_v53 = vld [vmem:[#allocation2 + $0x1a0] sm:$0xff]  ;;  %v901_v54 = vld [vmem:[#allocation2 + $0x1b0] sm:$0xff] }
 0x1c6   : > { %2210 = vmatpush1.bf16.msra.mxu0 %v2209_v56  ;;  %v2237_v37 = vpack.c.bf16 %v889_v36, %v887_v35  ;;  %v2239_v40 = vpack.c.bf16 %v894_v39, %v892_v38  ;;  %v2241_v43 = vpack.c.bf16 %v893_v42, %v891_v41  ;;  %v2243_v46 = vpack.c.bf16 %v898_v45, %v896_v44  ;;  %v904_v56 = vld [vmem:[#allocation2 + $0x1c8] sm:$0xff]  ;;  %v903_v59 = vld [vmem:[#allocation2 + $0x1c0] sm:$0xff]  ;;  %v905_v60 = vld [vmem:[#allocation2 + $0x1d0] sm:$0xff] }
 0x1c7   : > { %2212 = vmatprep.subr.bf16.mxu0 %v2211_v57  ;;  %v2245_v49 = vpack.c.bf16 %v897_v48, %v895_v47  ;;  %v2247_v52 = vpack.c.bf16 %v902_v51, %v900_v50  ;;  %v2249_v55 = vpack.c.bf16 %v901_v54, %v899_v53  ;;  %v906_v57 = vld [vmem:[#allocation2 + $0x1d8] sm:$0xff]  ;;  %v2253_v61 = vpack.c.bf16 %v905_v60, %v903_v59  ;;  %v907_v1 = vld [vmem:[#allocation2 + $0x1e0] sm:$0xff]  ;;  %v909_v4 = vld [vmem:[#allocation2 + $0x1f0] sm:$0xff] }
 0x1c8   : > { %v2251_v58 = vpack.c.bf16 %v906_v57, %v904_v56  ;;  %v2257_v5 = vpack.c.bf16 %v909_v4, %v907_v1  ;;  %v1176_v9 = vld [vmem:[#allocation5 + $0x8] sm:$0xff]  ;;  %v1207_v36 = vld [vmem:[#allocation5 + $0x100] sm:$0xff]  ;;  %vm818_vm1 = vcmask 1041408   ;;  %vm1946_vm4 = vcmask 32768  }
 0x1c9   : > { %v1180_v10 = vld [vmem:[#allocation5 + $0x28] sm:$0xff]  ;;  %v1215_v42 = vld [vmem:[#allocation5 + $0x140] sm:$0xff] }
 0x1ca   : > { %2214 = vmatpush1.bf16.msra.mxu0 %v2213_v63  ;;  %v908_v63 = vld [vmem:[#allocation2 + $0x1e8] sm:$0xff]  ;;  %v2291_v11 = vpack.c.bf16 %v1180_v10, %v1176_v9  ;;  %v1223_v48 = vld [vmem:[#allocation5 + $0x180] sm:$0xff] }
 0x1cb   : > { %2216 = vmatprep.subr.bf16.mxu0 %v2215_v0  ;;  %v910_v0 = vld [vmem:[#allocation2 + $0x1f8] sm:$0xff]  ;;  %v1184_v15 = vld [vmem:[#allocation5 + $0x48] sm:$0xff]  ;;  %v1231_v54 = vld [vmem:[#allocation5 + $0x1c0] sm:$0xff] }
 0x1cc   : > { %v2255_v3 = vpack.c.bf16 %v910_v0, %v908_v63  ;;  %2292 = vmatprep.subr.bf16.mxu1 %v2291_v11  ;;  %v1188_v16 = vld [vmem:[#allocation5 + $0x68] sm:$0xff]  ;;  %v1239_v60 = vld [vmem:[#allocation5 + $0x200] sm:$0xff] }
 0x1cd   : > { %v2295_v17 = vpack.c.bf16 %v1188_v16, %v1184_v15  ;;  %v1192_v21 = vld [vmem:[#allocation5 + $0x88] sm:$0xff]  ;;  %v2063_v4 = vld [vmem:[%s3469_s4] ss:$0 sm:$0xff] }
 0x1ce   : > { %2218 = vmatpush1.bf16.msra.mxu0 %v2217_v6  ;;  %v912_v6 = vld [vmem:[#allocation2 + $0x208] sm:$0xff] }
 0x1cf   : > { %2220 = vmatprep.subr.bf16.mxu0 %v2219_v7  ;;  %v914_v7 = vld [vmem:[#allocation2 + $0x218] sm:$0xff]  ;;  %v1196_v22 = vld [vmem:[#allocation5 + $0xa8] sm:$0xff] }
 0x1d0   : > { %v2259_v8 = vpack.c.bf16 %v914_v7, %v912_v6  ;;  %v2299_v23 = vpack.c.bf16 %v1196_v22, %v1192_v21  ;;  %v1200_v27 = vld [vmem:[#allocation5 + $0xc8] sm:$0xff] }
 0x1d1   : > { %v1208_v33 = vld [vmem:[#allocation5 + $0x108] sm:$0xff] }
 0x1d2   : > { %2222 = vmatpush1.bf16.msra.mxu0 %v2221_v12  ;;  %v1175_v12 = vld [vmem:[#allocation5] sm:$0xff]  ;;  %v1216_v39 = vld [vmem:[#allocation5 + $0x148] sm:$0xff] }
 0x1d3   : > { %2224 = vmatprep.subr.bf16.mxu0 %v2223_v13  ;;  %v1179_v13 = vld [vmem:[#allocation5 + $0x20] sm:$0xff]  ;;  %v1224_v45 = vld [vmem:[#allocation5 + $0x188] sm:$0xff] }
 0x1d4   : > { %v2293_v14 = vpack.c.bf16 %v1179_v13, %v1175_v12  ;;  %v1232_v51 = vld [vmem:[#allocation5 + $0x1c8] sm:$0xff] }
 0x1d5   : > { %v1240_v57 = vld [vmem:[#allocation5 + $0x208] sm:$0xff] }
 0x1d6   : > { %2226 = vmatpush1.bf16.msra.mxu0 %v2225_v18  ;;  %v1183_v18 = vld [vmem:[#allocation5 + $0x40] sm:$0xff]  ;;  %v1248_v0 = vld [vmem:[#allocation5 + $0x248] sm:$0xff] }
 0x1d7   : > { %2228 = vmatprep.subr.bf16.mxu0 %v2227_v19  ;;  %v1187_v19 = vld [vmem:[#allocation5 + $0x60] sm:$0xff]  ;;  %v1252_v1 = vld [vmem:[#allocation5 + $0x268] sm:$0xff] }
 0x1d8   : > { %v2297_v20 = vpack.c.bf16 %v1187_v19, %v1183_v18 }
 0x1da   : > { %2230 = vmatpush1.bf16.msra.mxu0 %v2229_v24  ;;  %v1191_v24 = vld [vmem:[#allocation5 + $0x80] sm:$0xff] }
 0x1db   : > { %2232 = vmatprep.subr.bf16.mxu0 %v2231_v25  ;;  %v1195_v25 = vld [vmem:[#allocation5 + $0xa0] sm:$0xff] }
 0x1dc   : > { %v2301_v26 = vpack.c.bf16 %v1195_v25, %v1191_v24 }
 0x1de   : > { %2234 = vmatpush1.bf16.msra.mxu0 %v2233_v28  ;;  %v1204_v28 = vld [vmem:[#allocation5 + $0xe8] sm:$0xff] }
 0x1df   : > { %2236 = vmatprep.subr.bf16.mxu0 %v2235_v34  ;;  %v1212_v34 = vld [vmem:[#allocation5 + $0x128] sm:$0xff] }
 0x1e0   : > { %v2307_v35 = vpack.c.bf16 %v1212_v34, %v1208_v33 }
 0x1e2   : > { %2238 = vmatpush1.bf16.msra.mxu0 %v2237_v37  ;;  %v1211_v37 = vld [vmem:[#allocation5 + $0x120] sm:$0xff] }
 0x1e3   : > { %2240 = vmatprep.subr.bf16.mxu0 %v2239_v40  ;;  %v2309_v38 = vpack.c.bf16 %v1211_v37, %v1207_v36  ;;  %v1220_v40 = vld [vmem:[#allocation5 + $0x168] sm:$0xff] }
 0x1e4   : > { %v2311_v41 = vpack.c.bf16 %v1220_v40, %v1216_v39 }
 0x1e6   : > { %2242 = vmatpush1.bf16.msra.mxu0 %v2241_v43  ;;  %v1219_v43 = vld [vmem:[#allocation5 + $0x160] sm:$0xff] }
 0x1e7   : > { %2244 = vmatprep.subr.bf16.mxu0 %v2243_v46  ;;  %v2313_v44 = vpack.c.bf16 %v1219_v43, %v1215_v42  ;;  %v1228_v46 = vld [vmem:[#allocation5 + $0x1a8] sm:$0xff]  ;;  %v913_v42 = vld [vmem:[#allocation2 + $0x210] sm:$0xff] }
 0x1e8   : > { %v2315_v47 = vpack.c.bf16 %v1228_v46, %v1224_v45  ;;  %v916_v43 = vld [vmem:[#allocation2 + $0x228] sm:$0xff] }
 0x1ea   : > { %2246 = vmatpush1.bf16.msra.mxu0 %v2245_v49  ;;  %v1227_v49 = vld [vmem:[#allocation5 + $0x1a0] sm:$0xff] }
 0x1eb   : > { %2248 = vmatprep.subr.bf16.mxu0 %v2247_v52  ;;  %v2317_v50 = vpack.c.bf16 %v1227_v49, %v1223_v48  ;;  %v1236_v52 = vld [vmem:[#allocation5 + $0x1e8] sm:$0xff] }
 0x1ec   : > { %v2319_v53 = vpack.c.bf16 %v1236_v52, %v1232_v51  ;;  %v915_v52 = vld [vmem:[#allocation2 + $0x220] sm:$0xff] }
 0x1ee   : > { %2250 = vmatpush1.bf16.msra.mxu0 %v2249_v55  ;;  %v1235_v55 = vld [vmem:[#allocation5 + $0x1e0] sm:$0xff] }
 0x1ef   : > { %2252 = vmatprep.subr.bf16.mxu0 %v2251_v58  ;;  %v2321_v56 = vpack.c.bf16 %v1235_v55, %v1231_v54  ;;  %v1244_v58 = vld [vmem:[#allocation5 + $0x228] sm:$0xff] }
 0x1f0   : > { %v2323_v59 = vpack.c.bf16 %v1244_v58, %v1240_v57  ;;  %v920_v55 = vld [vmem:[#allocation2 + $0x248] sm:$0xff]  ;;  %v2838_v58 = vmov 0.0  }
 0x1f2   : > { %2254 = vmatpush1.bf16.msra.mxu0 %v2253_v61  ;;  %v1243_v61 = vld [vmem:[#allocation5 + $0x220] sm:$0xff] }
 0x1f3   : > { %2256 = vmatprep.subr.bf16.mxu0 %v2255_v3  ;;  %v2325_v63 = vpack.c.bf16 %v1243_v61, %v1239_v60  ;;  %v2327_v3 = vpack.c.bf16 %v1252_v1, %v1248_v0  ;;  %v919_v60 = vld [vmem:[#allocation2 + $0x240] sm:$0xff]  ;;  %v921_v61 = vld [vmem:[#allocation2 + $0x250] sm:$0xff]  ;;  %v926_v0 = vld [vmem:[#allocation2 + $0x278] sm:$0xff] }
 0x1f4   : > { %v2269_v1 = vpack.c.bf16 %v921_v61, %v919_v60  ;;  %v1209_v60 = vld [vmem:[#allocation5 + $0x110] sm:$0xff] }
 0x1f5   : > { %v1213_v61 = vld [vmem:[#allocation5 + $0x130] sm:$0xff] }
 0x1f6   : > { %2258 = vmatpush1.bf16.msra.mxu0 %v2257_v5 }
 0x1f7   : > { %2260 = vmatprep.subr.bf16.mxu0 %v2259_v8 }
 0x237   : > { %v712_v29 = vpop.permute.xlu0 %711 }
 0x238   : > { %v715_v31 = vsel %vm714_vm0, %v693_v30, %v712_v29  ;;  %v2303_v29 = vpack.c.bf16 %v1204_v28, %v1200_v27  ;;  %v1199_v30 = vld [vmem:[#allocation5 + $0xc0] sm:$0xff] }
 0x239   : > { %790 = vmatmul.mubr.f32.vlgmr.msra.gmra.mrb[0].mxu1 %v715_v31  ;;  %v1203_v31 = vld [vmem:[#allocation5 + $0xe0] sm:$0xff] }
 0x23a   : > { %2294 = vmatpush1.bf16.msra.mxu1 %v2293_v14  ;;  %v2305_v32 = vpack.c.bf16 %v1203_v31, %v1199_v30 }
 0x23b   : > { %2296 = vmatprep.subr.bf16.mxu1 %v2295_v17 }
 0x23e   : > { %2298 = vmatpush1.bf16.msra.mxu1 %v2297_v20 }
 0x23f   : > { %2300 = vmatprep.subr.bf16.mxu1 %v2299_v23 }
 0x242   : > { %2302 = vmatpush1.bf16.msra.mxu1 %v2301_v26 }
 0x243   : > { %2304 = vmatprep.subr.bf16.mxu1 %v2303_v29 }
 0x246   : > { %2306 = vmatpush1.bf16.msra.mxu1 %v2305_v32 }
 0x247   : > { %2308 = vmatprep.subr.bf16.mxu1 %v2307_v35 }
 0x24a   : > { %2310 = vmatpush1.bf16.msra.mxu1 %v2309_v38 }
 0x24b   : > { %2312 = vmatprep.subr.bf16.mxu1 %v2311_v41  ;;  %v911_v41 = vld [vmem:[#allocation2 + $0x200] sm:$0xff] }
 0x24c   : > { %v2261_v49 = vpack.c.bf16 %v913_v42, %v911_v41 }
 0x24e   : > { %2314 = vmatpush1.bf16.msra.mxu1 %v2313_v44  ;;  %v918_v44 = vld [vmem:[#allocation2 + $0x238] sm:$0xff] }
 0x24f   : > { %2316 = vmatprep.subr.bf16.mxu1 %v2315_v47  ;;  %v2263_v51 = vpack.c.bf16 %v918_v44, %v916_v43  ;;  %v1185_v43 = vld [vmem:[#allocation5 + $0x50] sm:$0xff] }
 0x250   : > { %v1189_v44 = vld [vmem:[#allocation5 + $0x70] sm:$0xff] }
 0x252   : > { %2318 = vmatpush1.bf16.msra.mxu1 %v2317_v50 }
 0x253   : > { %2320 = vmatprep.subr.bf16.mxu1 %v2319_v53  ;;  %v917_v53 = vld [vmem:[#allocation2 + $0x230] sm:$0xff] }
 0x254   : > { %v2265_v57 = vpack.c.bf16 %v917_v53, %v915_v52  ;;  %v1197_v52 = vld [vmem:[#allocation5 + $0xb0] sm:$0xff] }
 0x256   : > { %2322 = vmatpush1.bf16.msra.mxu1 %v2321_v56  ;;  %v922_v56 = vld [vmem:[#allocation2 + $0x258] sm:$0xff] }
 0x257   : > { %2324 = vmatprep.subr.bf16.mxu1 %v2323_v59  ;;  %v2267_v59 = vpack.c.bf16 %v922_v56, %v920_v55  ;;  %v1201_v55 = vld [vmem:[#allocation5 + $0xd0] sm:$0xff] }
 0x258   : > { %v1205_v56 = vld [vmem:[#allocation5 + $0xf0] sm:$0xff] }
 0x25a   : > { %2326 = vmatpush1.bf16.msra.mxu1 %v2325_v63  ;;  %v924_v63 = vld [vmem:[#allocation2 + $0x268] sm:$0xff] }
 0x25b   : > { %2328 = vmatprep.subr.bf16.mxu1 %v2327_v3  ;;  %v2271_v3 = vpack.c.bf16 %v926_v0, %v924_v63  ;;  %v1218_v63 = vld [vmem:[#allocation5 + $0x158] sm:$0xff] }
 0x25c   : > { %v1222_v0 = vld [vmem:[#allocation5 + $0x178] sm:$0xff] }
 0x30c   : > { %v791_v5 = vpop.f32.mrb[0].mxu1 }
 0x30d   : > { %v792_v6 = vadd.f32 %v2063_v4, %v791_v5  ;;  %v793_v7 = vpop.f32.mrb[1].mxu1  ;;  %v923_v4 = vld [vmem:[#allocation2 + $0x260] sm:$0xff]  ;;  %v925_v5 = vld [vmem:[#allocation2 + $0x270] sm:$0xff] }
 0x30e   : > { %v930_v7 = vld [vmem:[#allocation2 + $0x298] sm:$0xff] }
 0x30f   : > { %v795_v8 = vmax.f32 %v792_v6, 0.0  ;;  %v928_v6 = vld [vmem:[#allocation2 + $0x288] sm:$0xff] }
 0x311   : > { %v797_v9 = vcombine.high %v795_v8, %v795_v8  ;;  %v804_v10 = vrot.slane %v795_v8, %v3113_v2  ;;  %v2273_v8 = vpack.c.bf16 %v925_v5, %v923_v4  ;;  %v1217_v4 = vld [vmem:[#allocation5 + $0x150] sm:$0xff] }
 0x312   : > { %v1221_v5 = vld [vmem:[#allocation5 + $0x170] sm:$0xff] }
 0x313   : > { %v811_v11 = vrot.slane %v797_v9, %v3113_v2  ;;  %v812_v12 = vcombine.high %v804_v10, %v804_v10  ;;  %v819_v13 = vsel %vm818_vm1, %v804_v10, -inf  ;;  %v2275_v9 = vpack.c.bf16 %v930_v7, %v928_v6  ;;  %v927_v10 = vld [vmem:[#allocation2 + $0x280] sm:$0xff]  ;;  %v1226_v6 = vld [vmem:[#allocation5 + $0x198] sm:$0xff] }
 0x314   : > { %v820_v14 = vrot.slane %v819_v13, 4  ;;  %v1230_v7 = vld [vmem:[#allocation5 + $0x1b8] sm:$0xff] }
 0x315   : > { %v813_v15 = vcombine.high %v811_v11, %v811_v11  ;;  %v826_v16 = vsel %vm818_vm1, %v812_v12, -inf  ;;  %v833_v17 = vsel %vm818_vm1, %v811_v11, -inf  ;;  %v929_v11 = vld [vmem:[#allocation2 + $0x290] sm:$0xff]  ;;  %v932_v12 = vld [vmem:[#allocation2 + $0x2a8] sm:$0xff] }
 0x316   : > { %v821_v18 = vmax.f32 %v819_v13, %v820_v14  ;;  %v827_v19 = vrot.slane %v826_v16, 4  ;;  %v834_v20 = vrot.slane %v833_v17, 4  ;;  %v934_v13 = vld [vmem:[#allocation2 + $0x2b8] sm:$0xff]  ;;  %v2277_v14 = vpack.c.bf16 %v929_v11, %v927_v10  ;;  %v1225_v10 = vld [vmem:[#allocation5 + $0x190] sm:$0xff] }
 0x317   : > { %v840_v21 = vsel %vm818_vm1, %v813_v15, -inf  ;;  %v2279_v15 = vpack.c.bf16 %v934_v13, %v932_v12  ;;  %v1229_v11 = vld [vmem:[#allocation5 + $0x1b0] sm:$0xff]  ;;  %v1234_v12 = vld [vmem:[#allocation5 + $0x1d8] sm:$0xff] }
 0x318   : > { %v822_v22 = vrot.slane %v821_v18, 2  ;;  %v828_v23 = vmax.f32 %v826_v16, %v827_v19  ;;  %v835_v24 = vmax.f32 %v833_v17, %v834_v20  ;;  %v841_v25 = vrot.slane %v840_v21, 4  ;;  %v931_v16 = vld [vmem:[#allocation2 + $0x2a0] sm:$0xff]  ;;  %v933_v17 = vld [vmem:[#allocation2 + $0x2b0] sm:$0xff]  ;;  %v938_v19 = vld [vmem:[#allocation2 + $0x2d8] sm:$0xff] }
 0x319   : > { %v2281_v20 = vpack.c.bf16 %v933_v17, %v931_v16  ;;  %v1238_v13 = vld [vmem:[#allocation5 + $0x1f8] sm:$0xff]  ;;  %v1233_v16 = vld [vmem:[#allocation5 + $0x1d0] sm:$0xff] }
 0x31a   : > { %v823_v26 = vmax.f32 %v821_v18, %v822_v22  ;;  %v829_v27 = vrot.slane %v828_v23, 2  ;;  %v836_v28 = vrot.slane %v835_v24, 2  ;;  %v842_v29 = vmax.f32 %v840_v21, %v841_v25  ;;  %v936_v18 = vld [vmem:[#allocation2 + $0x2c8] sm:$0xff]  ;;  %v935_v22 = vld [vmem:[#allocation2 + $0x2c0] sm:$0xff]  ;;  %v942_v25 = vld [vmem:[#allocation2 + $0x2f8] sm:$0xff] }
 0x31b   : > { %v2283_v21 = vpack.c.bf16 %v938_v19, %v936_v18  ;;  %v1237_v17 = vld [vmem:[#allocation5 + $0x1f0] sm:$0xff]  ;;  %v1242_v18 = vld [vmem:[#allocation5 + $0x218] sm:$0xff] }
 0x31c   : > { %v824_v30 = vrot.slane %v823_v26, 1  ;;  %v830_v31 = vmax.f32 %v828_v23, %v829_v27  ;;  %v837_v32 = vmax.f32 %v835_v24, %v836_v28  ;;  %v843_v33 = vrot.slane %v842_v29, 2  ;;  %v937_v23 = vld [vmem:[#allocation2 + $0x2d0] sm:$0xff]  ;;  %v940_v24 = vld [vmem:[#allocation2 + $0x2e8] sm:$0xff]  ;;  %v939_v28 = vld [vmem:[#allocation2 + $0x2e0] sm:$0xff] }
 0x31d   : > { %v2287_v27 = vpack.c.bf16 %v942_v25, %v940_v24  ;;  %v1246_v19 = vld [vmem:[#allocation5 + $0x238] sm:$0xff] }
 0x31e   : > { %v831_v34 = vrot.slane %v830_v31, 1  ;;  %v838_v35 = vrot.slane %v837_v32, 1  ;;  %v844_v36 = vmax.f32 %v842_v29, %v843_v33  ;;  %v825_v37 = vmax.f32 %v823_v26, %v824_v30  ;;  %v941_v29 = vld [vmem:[#allocation2 + $0x2f0] sm:$0xff]  ;;  %v1178_v30 = vld [vmem:[#allocation5 + $0x18] sm:$0xff] }
 0x31f   : > { %v2285_v26 = vpack.c.bf16 %v937_v23, %v935_v22  ;;  %v1241_v22 = vld [vmem:[#allocation5 + $0x210] sm:$0xff]  ;;  %v1250_v24 = vld [vmem:[#allocation5 + $0x258] sm:$0xff] }
 0x320   : > { %v3159_v38 = vmax.f32 %v830_v31, %v831_v34  ;;  %v3161_v39 = vmax.f32 %v837_v32, %v838_v35  ;;  %v845_v40 = vrot.slane %v844_v36, 1  ;;  %v1182_v31 = vld [vmem:[#allocation5 + $0x38] sm:$0xff]  ;;  %v2289_v32 = vpack.c.bf16 %v941_v29, %v939_v28  ;;  %v1177_v34 = vld [vmem:[#allocation5 + $0x10] sm:$0xff]  ;;  %v1247_v28 = vld [vmem:[#allocation5 + $0x240] sm:$0xff] }
 0x321   : > { %v2419_v33 = vpack.c.bf16 %v1182_v31, %v1178_v30  ;;  %v1181_v35 = vld [vmem:[#allocation5 + $0x30] sm:$0xff]  ;;  %v1254_v25 = vld [vmem:[#allocation5 + $0x278] sm:$0xff]  ;;  %v1251_v29 = vld [vmem:[#allocation5 + $0x260] sm:$0xff] }
 0x322   : > { %v3163_v45 = vmax.f32 %v844_v36, %v845_v40  ;;  %v957_v46 = vsel %vm695_vm10, %v3159_v38, %v825_v37  ;;  %v947_v47 = vsel %vm680_vm9, %v3159_v38, %v825_v37  ;;  %v1186_v36 = vld [vmem:[#allocation5 + $0x58] sm:$0xff]  ;;  %v952_v40 = vsel %vm695_vm10, %v3161_v39, %v3159_v38  ;;  %v1245_v23 = vld [vmem:[#allocation5 + $0x230] sm:$0xff] }
 0x323   : > { %v958_v48 = vsel %vm680_vm9, %v3161_v39, %v957_v46  ;;  %v948_v54 = vsel %vm682_vm11, %v3161_v39, %v947_v47  ;;  %v1190_v37 = vld [vmem:[#allocation5 + $0x78] sm:$0xff]  ;;  %v2421_v41 = vpack.c.bf16 %v1181_v35, %v1177_v34  ;;  %v1249_v30 = vld [vmem:[#allocation5 + $0x250] sm:$0xff]  ;;  %v2329_v31 = vpack.c.bf16 %v1251_v29, %v1247_v28  ;;  %v1256_v34 = vld [vmem:[#allocation5 + $0x288] sm:$0xff] }
 0x324   : > { %v959_v50 = vsel %vm682_vm11, %v3163_v45, %v958_v48  ;;  %v2423_v42 = vpack.c.bf16 %v1190_v37, %v1186_v36  ;;  %v953_v46 = vsel %vm680_vm9, %v3163_v45, %v952_v40  ;;  %v1194_v47 = vld [vmem:[#allocation5 + $0x98] sm:$0xff]  ;;  %v2433_v45 = vpack.c.bf16 %v1205_v56, %v1201_v55  ;;  %v1260_v35 = vld [vmem:[#allocation5 + $0x2a8] sm:$0xff]  ;;  %v1265_v56 = vld [vmem:[#allocation5 + $0x2d0] sm:$0xff] }
 0x325   : > { %1036 = vmatprep.mubr.f32.mxu0 %v959_v50  ;;  %v1198_v48 = vld [vmem:[#allocation5 + $0xb8] sm:$0xff]  ;;  %2330 = vmatpush1.bf16.msra.mxu1 %v2329_v31  ;;  %v2331_v37 = vpack.c.bf16 %v1260_v35, %v1256_v34  ;;  %v1289_v29 = vld [vmem:[#allocation5 + $0x390] sm:$0xff]  ;;  %v1296_v31 = vld [vmem:[#allocation5 + $0x3c8] sm:$0xff] }
 0x326   : > { %2066 = vmatmul.mubr.msk.f32.vlgmr.msra.gmra.mrb[2].mxu0 %vm2065_vm2, %v948_v54  ;;  %v2427_v50 = vpack.c.bf16 %v1198_v48, %v1194_v47  ;;  %v1202_v38 = vld [vmem:[#allocation5 + $0xd8] sm:$0xff]  ;;  %v1261_v47 = vld [vmem:[#allocation5 + $0x2b0] sm:$0xff] }
 0x327   : > { %2262 = vmatpush1.bf16.msra.mxu0 %v2261_v49  ;;  %1107 = vmatprep.mubr.f32.mxu0 %v2838_v58  ;;  %v2425_v49 = vpack.c.bf16 %v1189_v44, %v1185_v43  ;;  %v1206_v39 = vld [vmem:[#allocation5 + $0xf8] sm:$0xff] }
 0x328   : > { %2264 = vmatprep.subr.bf16.mxu0 %v2263_v51  ;;  %v1193_v51 = vld [vmem:[#allocation5 + $0x90] sm:$0xff]  ;;  %v2431_v54 = vpack.c.bf16 %v1206_v39, %v1202_v38  ;;  %v1214_v58 = vld [vmem:[#allocation5 + $0x138] sm:$0xff]  ;;  %2332 = vmatprep.subr.bf16.mxu1 %v2331_v37  ;;  %v1263_v39 = vld [vmem:[#allocation5 + $0x2c0] sm:$0xff] }
 0x329   : > { %v2429_v53 = vpack.c.bf16 %v1197_v52, %v1193_v51  ;;  %v1258_v36 = vld [vmem:[#allocation5 + $0x298] sm:$0xff] }
 0x32a   : > { %v1262_v40 = vld [vmem:[#allocation5 + $0x2b8] sm:$0xff] }
 0x32b   : > { %2266 = vmatpush1.bf16.msra.mxu0 %v2265_v57  ;;  %v1210_v57 = vld [vmem:[#allocation5 + $0x118] sm:$0xff]  ;;  %v2459_v43 = vpack.c.bf16 %v1262_v40, %v1258_v36  ;;  %v1295_v40 = vld [vmem:[#allocation5 + $0x3c0] sm:$0xff] }
 0x32c   : > { %2268 = vmatprep.subr.bf16.mxu0 %v2267_v59  ;;  %v2435_v59 = vpack.c.bf16 %v1214_v58, %v1210_v57  ;;  %v1266_v51 = vld [vmem:[#allocation5 + $0x2d8] sm:$0xff]  ;;  %v1269_v57 = vld [vmem:[#allocation5 + $0x2f0] sm:$0xff] }
 0x32d   : > { %v1270_v38 = vld [vmem:[#allocation5 + $0x2f8] sm:$0xff]  ;;  %v2465_v58 = vpack.c.bf16 %v1269_v57, %v1265_v56 }
 0x32e   : > { %v1298_v34 = vld [vmem:[#allocation5 + $0x3d8] sm:$0xff] }
 0x32f   : > { %2270 = vmatpush1.bf16.msra.mxu0 %v2269_v1  ;;  %v2437_v1 = vpack.c.bf16 %v1213_v61, %v1209_v60  ;;  %v1274_v60 = vld [vmem:[#allocation5 + $0x318] sm:$0xff] }
 0x330   : > { %2272 = vmatprep.subr.bf16.mxu0 %v2271_v3  ;;  %v2439_v3 = vpack.c.bf16 %v1222_v0, %v1218_v63  ;;  %v1278_v63 = vld [vmem:[#allocation5 + $0x338] sm:$0xff]  ;;  %v1271_v0 = vld [vmem:[#allocation5 + $0x300] sm:$0xff] }
 0x331   : > { %v1302_v35 = vld [vmem:[#allocation5 + $0x3f8] sm:$0xff] }
 0x332   : > { %v2479_v37 = vpack.c.bf16 %v1302_v35, %v1298_v34  ;;  %v1311_v34 = vld [vmem:[#allocation5 + $0x440] sm:$0xff] }
 0x333   : > { %2274 = vmatpush1.bf16.msra.mxu0 %v2273_v8  ;;  %v2441_v8 = vpack.c.bf16 %v1221_v5, %v1217_v4  ;;  %v1273_v5 = vld [vmem:[#allocation5 + $0x310] sm:$0xff]  ;;  %v1315_v35 = vld [vmem:[#allocation5 + $0x460] sm:$0xff] }
 0x334   : > { %2276 = vmatprep.subr.bf16.mxu0 %v2275_v9  ;;  %v2443_v9 = vpack.c.bf16 %v1230_v7, %v1226_v6  ;;  %v1277_v6 = vld [vmem:[#allocation5 + $0x330] sm:$0xff] }
 0x335   : > { %v2469_v7 = vpack.c.bf16 %v1277_v6, %v1273_v5 }
 0x337   : > { %2278 = vmatpush1.bf16.msra.mxu0 %v2277_v14  ;;  %v2445_v14 = vpack.c.bf16 %v1229_v11, %v1225_v10  ;;  %v1282_v10 = vld [vmem:[#allocation5 + $0x358] sm:$0xff] }
 0x338   : > { %2280 = vmatprep.subr.bf16.mxu0 %v2279_v15  ;;  %v2447_v15 = vpack.c.bf16 %v1238_v13, %v1234_v12  ;;  %v1286_v12 = vld [vmem:[#allocation5 + $0x378] sm:$0xff]  ;;  %v1279_v13 = vld [vmem:[#allocation5 + $0x340] sm:$0xff] }
 0x33b   : > { %2282 = vmatpush1.bf16.msra.mxu0 %v2281_v20  ;;  %v2449_v20 = vpack.c.bf16 %v1237_v17, %v1233_v16  ;;  %v1281_v17 = vld [vmem:[#allocation5 + $0x350] sm:$0xff] }
 0x33c   : > { %2284 = vmatprep.subr.bf16.mxu0 %v2283_v21  ;;  %v2451_v21 = vpack.c.bf16 %v1246_v19, %v1242_v18  ;;  %v1285_v18 = vld [vmem:[#allocation5 + $0x370] sm:$0xff] }
 0x33d   : > { %v2473_v19 = vpack.c.bf16 %v1285_v18, %v1281_v17  ;;  %v1303_v18 = vld [vmem:[#allocation5 + $0x400] sm:$0xff] }
 0x33f   : > { %2286 = vmatpush1.bf16.msra.mxu0 %v2285_v26  ;;  %v2453_v26 = vpack.c.bf16 %v1245_v23, %v1241_v22  ;;  %v1290_v22 = vld [vmem:[#allocation5 + $0x398] sm:$0xff] }
 0x340   : > { %2288 = vmatprep.subr.bf16.mxu0 %v2287_v27  ;;  %v2455_v27 = vpack.c.bf16 %v1254_v25, %v1250_v24  ;;  %v1294_v24 = vld [vmem:[#allocation5 + $0x3b8] sm:$0xff]  ;;  %v1287_v25 = vld [vmem:[#allocation5 + $0x380] sm:$0xff] }
 0x343   : > { %2290 = vmatpush1.bf16.msra.mxu0 %v2289_v32  ;;  %v1253_v32 = vld [vmem:[#allocation5 + $0x270] sm:$0xff] }
 0x344   : > { %2420 = vmatprep.subr.bf16.mxu0 %v2419_v33  ;;  %v2457_v33 = vpack.c.bf16 %v1253_v32, %v1249_v30  ;;  %v1293_v30 = vld [vmem:[#allocation5 + $0x3b0] sm:$0xff] }
 0x345   : > { %v2477_v32 = vpack.c.bf16 %v1293_v30, %v1289_v29  ;;  %v1318_v29 = vld [vmem:[#allocation5 + $0x478] sm:$0xff] }
 0x346   : > { %2067 = vmatmul.mubr.msk.f32.vlgmr.msra.gmra.mrb[2].mxu0 %vm955_vm3, %v953_v46  ;;  %v1257_v46 = vld [vmem:[#allocation5 + $0x290] sm:$0xff] }
 0x347   : > { %2422 = vmatpush1.bf16.msra.mxu0 %v2421_v41  ;;  %v1255_v41 = vld [vmem:[#allocation5 + $0x280] sm:$0xff]  ;;  %v2461_v48 = vpack.c.bf16 %v1261_v47, %v1257_v46  ;;  %v1304_v47 = vld [vmem:[#allocation5 + $0x408] sm:$0xff] }
 0x348   : > { %2424 = vmatprep.subr.bf16.mxu0 %v2423_v42  ;;  %v1259_v42 = vld [vmem:[#allocation5 + $0x2a0] sm:$0xff] }
 0x349   : > { %v2333_v44 = vpack.c.bf16 %v1259_v42, %v1255_v41  ;;  %v1299_v41 = vld [vmem:[#allocation5 + $0x3e0] sm:$0xff]  ;;  %v1297_v42 = vld [vmem:[#allocation5 + $0x3d0] sm:$0xff] }
 0x34b   : > { %2426 = vmatpush1.bf16.msra.mxu0 %v2425_v49  ;;  %2334 = vmatpush1.bf16.msra.mxu1 %v2333_v44  ;;  %v1264_v49 = vld [vmem:[#allocation5 + $0x2c8] sm:$0xff]  ;;  %v1301_v44 = vld [vmem:[#allocation5 + $0x3f0] sm:$0xff] }
 0x34c   : > { %2428 = vmatprep.subr.bf16.mxu0 %v2427_v50  ;;  %v1268_v50 = vld [vmem:[#allocation5 + $0x2e8] sm:$0xff]  ;;  %v2481_v46 = vpack.c.bf16 %v1301_v44, %v1297_v42 }
 0x34d   : > { %v2335_v52 = vpack.c.bf16 %v1268_v50, %v1264_v49  ;;  %v1306_v49 = vld [vmem:[#allocation5 + $0x418] sm:$0xff] }
 0x34f   : > { %2430 = vmatpush1.bf16.msra.mxu0 %v2429_v53  ;;  %v1267_v53 = vld [vmem:[#allocation5 + $0x2e0] sm:$0xff]  ;;  %2336 = vmatprep.subr.bf16.mxu1 %v2335_v52 }
 0x350   : > { %2432 = vmatprep.subr.bf16.mxu0 %v2431_v54  ;;  %v2463_v54 = vpack.c.bf16 %v1270_v38, %v1266_v51  ;;  %v2337_v55 = vpack.c.bf16 %v1267_v53, %v1263_v39  ;;  %v1310_v51 = vld [vmem:[#allocation5 + $0x438] sm:$0xff]  ;;  %v964_v38 = vsub.s32 0, %v3107_v62  ;;  %v943_v39 = vld [vmem:[%s3471_s6] sm:$0x3]  ;;  %v968_v53 = vsub.s32 1, %v3107_v62 }
 0x351   : > { %v2483_v52 = vpack.c.bf16 %v1310_v51, %v1306_v49  ;;  %v2361_v49 = vpack.c.bf16 %v1315_v35, %v1311_v34  ;;  %v1319_v51 = vld [vmem:[#allocation5 + $0x480] sm:$0xff] }
 0x352   : > { %2338 = vmatpush1.bf16.msra.mxu1 %v2337_v55  ;;  %v969_v55 = vrot.slane %v943_v39, %v968_v53 }
 0x353   : > { %2434 = vmatpush1.bf16.msra.mxu0 %v2433_v45  ;;  %v1272_v45 = vld [vmem:[#allocation5 + $0x308] sm:$0xff] }
 0x354   : > { %2436 = vmatprep.subr.bf16.mxu0 %v2435_v59  ;;  %v1276_v59 = vld [vmem:[#allocation5 + $0x328] sm:$0xff] }
 0x355   : > { %v2339_v61 = vpack.c.bf16 %v1276_v59, %v1272_v45 }
 0x357   : > { %2438 = vmatpush1.bf16.msra.mxu0 %v2437_v1  ;;  %v1275_v1 = vld [vmem:[#allocation5 + $0x320] sm:$0xff]  ;;  %2340 = vmatprep.subr.bf16.mxu1 %v2339_v61 }
 0x358   : > { %2440 = vmatprep.subr.bf16.mxu0 %v2439_v3  ;;  %v2467_v3 = vpack.c.bf16 %v1278_v63, %v1274_v60  ;;  %v2341_v4 = vpack.c.bf16 %v1275_v1, %v1271_v0 }
 0x35a   : > { %2342 = vmatpush1.bf16.msra.mxu1 %v2341_v4 }
 0x35b   : > { %2442 = vmatpush1.bf16.msra.mxu0 %v2441_v8  ;;  %v1280_v8 = vld [vmem:[#allocation5 + $0x348] sm:$0xff] }
 0x35c   : > { %2444 = vmatprep.subr.bf16.mxu0 %v2443_v9  ;;  %v1284_v9 = vld [vmem:[#allocation5 + $0x368] sm:$0xff] }
 0x35d   : > { %v2343_v11 = vpack.c.bf16 %v1284_v9, %v1280_v8 }
 0x35f   : > { %2446 = vmatpush1.bf16.msra.mxu0 %v2445_v14  ;;  %v1283_v14 = vld [vmem:[#allocation5 + $0x360] sm:$0xff]  ;;  %2344 = vmatprep.subr.bf16.mxu1 %v2343_v11 }
 0x360   : > { %2448 = vmatprep.subr.bf16.mxu0 %v2447_v15  ;;  %v2471_v15 = vpack.c.bf16 %v1286_v12, %v1282_v10  ;;  %v2345_v16 = vpack.c.bf16 %v1283_v14, %v1279_v13 }
 0x362   : > { %2346 = vmatpush1.bf16.msra.mxu1 %v2345_v16 }
 0x363   : > { %2450 = vmatpush1.bf16.msra.mxu0 %v2449_v20  ;;  %v1288_v20 = vld [vmem:[#allocation5 + $0x388] sm:$0xff] }
 0x364   : > { %2452 = vmatprep.subr.bf16.mxu0 %v2451_v21  ;;  %v1292_v21 = vld [vmem:[#allocation5 + $0x3a8] sm:$0xff] }
 0x365   : > { %v2347_v23 = vpack.c.bf16 %v1292_v21, %v1288_v20  ;;  %v1307_v21 = vld [vmem:[#allocation5 + $0x420] sm:$0xff] }
 0x367   : > { %2454 = vmatpush1.bf16.msra.mxu0 %v2453_v26  ;;  %v1291_v26 = vld [vmem:[#allocation5 + $0x3a0] sm:$0xff]  ;;  %2348 = vmatprep.subr.bf16.mxu1 %v2347_v23  ;;  %v1309_v23 = vld [vmem:[#allocation5 + $0x430] sm:$0xff] }
 0x368   : > { %2456 = vmatprep.subr.bf16.mxu0 %v2455_v27  ;;  %v2475_v27 = vpack.c.bf16 %v1294_v24, %v1290_v22  ;;  %v2349_v28 = vpack.c.bf16 %v1291_v26, %v1287_v25  ;;  %v1305_v22 = vld [vmem:[#allocation5 + $0x410] sm:$0xff]  ;;  %v1312_v26 = vld [vmem:[#allocation5 + $0x448] sm:$0xff] }
 0x36a   : > { %2350 = vmatpush1.bf16.msra.mxu1 %v2349_v28  ;;  %v1314_v28 = vld [vmem:[#allocation5 + $0x458] sm:$0xff] }
 0x36b   : > { %2458 = vmatpush1.bf16.msra.mxu0 %v2457_v33  ;;  %v1300_v33 = vld [vmem:[#allocation5 + $0x3e8] sm:$0xff]  ;;  %v2487_v44 = vpack.c.bf16 %v1318_v29, %v1314_v28  ;;  %v1345_v28 = vld [vmem:[#allocation5 + $0x550] sm:$0xff] }
 0x36c   : > { %2460 = vmatprep.subr.bf16.mxu0 %v2459_v43  ;;  %v2351_v36 = vpack.c.bf16 %v1300_v33, %v1296_v31  ;;  %v2353_v43 = vpack.c.bf16 %v1299_v41, %v1295_v40  ;;  %v2357_v31 = vpack.c.bf16 %v1307_v21, %v1303_v18  ;;  %v1317_v40 = vld [vmem:[#allocation5 + $0x470] sm:$0xff]  ;;  %v1320_v41 = vld [vmem:[#allocation5 + $0x488] sm:$0xff]  ;;  %v1350_v21 = vld [vmem:[#allocation5 + $0x578] sm:$0xff] }
 0x36d   : > { %v1344_v18 = vld [vmem:[#allocation5 + $0x548] sm:$0xff]  ;;  %v1349_v29 = vld [vmem:[#allocation5 + $0x570] sm:$0xff] }
 0x36e   : > { %2352 = vmatprep.subr.bf16.mxu1 %v2351_v36  ;;  %v2505_v35 = vpack.c.bf16 %v1349_v29, %v1345_v28  ;;  %v1385_v28 = vld [vmem:[#allocation5 + $0x690] sm:$0xff] }
 0x36f   : > { %2462 = vmatpush1.bf16.msra.mxu0 %v2461_v48  ;;  %2354 = vmatpush1.bf16.msra.mxu1 %v2353_v43  ;;  %v1308_v48 = vld [vmem:[#allocation5 + $0x428] sm:$0xff]  ;;  %v1389_v29 = vld [vmem:[#allocation5 + $0x6b0] sm:$0xff] }
 0x370   : > { %2464 = vmatprep.subr.bf16.mxu0 %v2463_v54  ;;  %v2355_v50 = vpack.c.bf16 %v1308_v48, %v1304_v47  ;;  %v965_v54 = vrot.slane %v943_v39, %v964_v38  ;;  %v1322_v47 = vld [vmem:[#allocation5 + $0x498] sm:$0xff] }
 0x371   : > { %v1326_v48 = vld [vmem:[#allocation5 + $0x4b8] sm:$0xff] }
 0x372   : > { %2356 = vmatprep.subr.bf16.mxu1 %v2355_v50 }
 0x373   : > { %2466 = vmatpush1.bf16.msra.mxu0 %v2465_v58 }
 0x374   : > { %2468 = vmatprep.subr.bf16.mxu0 %v2467_v3 }
 0x377   : > { %2470 = vmatpush1.bf16.msra.mxu0 %v2469_v7 }
 0x378   : > { %2472 = vmatprep.subr.bf16.mxu0 %v2471_v15 }
 0x37b   : > { %2474 = vmatpush1.bf16.msra.mxu0 %v2473_v19 }
 0x37c   : > { %2476 = vmatprep.subr.bf16.mxu0 %v2475_v27  ;;  %v1316_v27 = vld [vmem:[#allocation5 + $0x468] sm:$0xff] }
 0x37d   : > { %v2359_v43 = vpack.c.bf16 %v1316_v27, %v1312_v26 }
 0x37f   : > { %2478 = vmatpush1.bf16.msra.mxu0 %v2477_v32  ;;  %v2485_v32 = vpack.c.bf16 %v1309_v23, %v1305_v22 }
 0x380   : > { %2480 = vmatprep.subr.bf16.mxu0 %v2479_v37  ;;  %v1313_v37 = vld [vmem:[#allocation5 + $0x450] sm:$0xff] }
 0x381   : > { %v2489_v50 = vpack.c.bf16 %v1317_v40, %v1313_v37  ;;  %v1355_v37 = vld [vmem:[#allocation5 + $0x5a0] sm:$0xff] }
 0x383   : > { %2482 = vmatpush1.bf16.msra.mxu0 %v2481_v46  ;;  %v1324_v46 = vld [vmem:[#allocation5 + $0x4a8] sm:$0xff] }
 0x384   : > { %2484 = vmatprep.subr.bf16.mxu0 %v2483_v52  ;;  %v1323_v52 = vld [vmem:[#allocation5 + $0x4a0] sm:$0xff]  ;;  %v2363_v39 = vpack.c.bf16 %v1324_v46, %v1320_v41  ;;  %v1364_v46 = vld [vmem:[#allocation5 + $0x5e8] sm:$0xff] }
 0x419   : > { %v1109_v56 = vpop.f32.mrb[2].mxu0 }
 0x41a   : > { %v2611_v57 = vadd.f32 %v1109_v56, %v965_v54  ;;  %v1111_v58 = vpop.f32.mrb[3].mxu0  ;;  %v2491_v54 = vpack.c.bf16 %v1326_v48, %v1322_v47  ;;  %v1325_v56 = vld [vmem:[#allocation5 + $0x4b0] sm:$0xff]  ;;  %v1362_v47 = vld [vmem:[#allocation5 + $0x5d8] sm:$0xff] }
 0x41b   : > { %v2612_v45 = vadd.f32 %v1111_v58, %v969_v55  ;;  %v1321_v55 = vld [vmem:[#allocation5 + $0x490] sm:$0xff]  ;;  %v1332_v58 = vld [vmem:[#allocation5 + $0x4e8] sm:$0xff]  ;;  %v1366_v48 = vld [vmem:[#allocation5 + $0x5f8] sm:$0xff] }
 0x41c   : > { %v1114_v59 = vmax.f32 %v2611_v57, 0.0  ;;  %v1328_v57 = vld [vmem:[#allocation5 + $0x4c8] sm:$0xff] }
 0x41d   : > { %v1115_v60 = vmax.f32 %v2612_v45, 0.0  ;;  %v1330_v45 = vld [vmem:[#allocation5 + $0x4d8] sm:$0xff] }
 0x41f   : > { %v1118_v61 = vcombine.low %v1114_v59, %v1115_v60  ;;  %v1334_v59 = vld [vmem:[#allocation5 + $0x4f8] sm:$0xff]  ;;  %v2365_v60 = vpack.c.bf16 %v1323_v52, %v1319_v51  ;;  %v1359_v51 = vld [vmem:[#allocation5 + $0x5c0] sm:$0xff] }
 0x420   : > { %v1363_v52 = vld [vmem:[#allocation5 + $0x5e0] sm:$0xff] }
 0x421   : > { %v1125_v63 = vrot.slane %v1118_v61, %v3113_v2  ;;  %v2493_v61 = vpack.c.bf16 %v1325_v56, %v1321_v55  ;;  %v1361_v55 = vld [vmem:[#allocation5 + $0x5d0] sm:$0xff] }
 0x422   : > { %v1365_v56 = vld [vmem:[#allocation5 + $0x5f0] sm:$0xff] }
 0x423   : > { %v1126_v0 = vcombine.high %v1125_v63, %v1125_v63  ;;  %v1133_v1 = vrot.slane %v1125_v63, %v3113_v2  ;;  %v1327_v63 = vld [vmem:[#allocation5 + $0x4c0] sm:$0xff] }
 0x425   : > { %v1134_v3 = vcombine.high %v1133_v1, %v1133_v1  ;;  %v3193_v4 = vrot.slane %v1126_v0, %v3113_v2  ;;  %v1147_v5 = vsel %vm818_vm1, %v1133_v1, -inf  ;;  %v1331_v0 = vld [vmem:[#allocation5 + $0x4e0] sm:$0xff]  ;;  %v2367_v1 = vpack.c.bf16 %v1332_v58, %v1328_v57  ;;  %v1368_v57 = vld [vmem:[#allocation5 + $0x608] sm:$0xff] }
 0x426   : > { %v1148_v6 = vrot.slane %v1147_v5, 4  ;;  %v1372_v58 = vld [vmem:[#allocation5 + $0x628] sm:$0xff] }
 0x427   : > { %v1154_v7 = vsel %vm818_vm1, %v1134_v3, -inf  ;;  %v1142_v8 = vcombine.high %v3193_v4, %v3193_v4  ;;  %v2495_v3 = vpack.c.bf16 %v1334_v59, %v1330_v45  ;;  %v1370_v45 = vld [vmem:[#allocation5 + $0x618] sm:$0xff] }
 0x428   : > { %v1149_v9 = vmax.f32 %v1147_v5, %v1148_v6  ;;  %v1155_v10 = vrot.slane %v1154_v7, 4  ;;  %v1329_v5 = vld [vmem:[#allocation5 + $0x4d0] sm:$0xff]  ;;  %v1374_v59 = vld [vmem:[#allocation5 + $0x638] sm:$0xff] }
 0x429   : > { %v1168_v11 = vsel %vm818_vm1, %v1142_v8, -inf  ;;  %v1333_v6 = vld [vmem:[#allocation5 + $0x4f0] sm:$0xff]  ;;  %v1340_v8 = vld [vmem:[#allocation5 + $0x528] sm:$0xff] }
 0x42a   : > { %v1156_v12 = vmax.f32 %v1154_v7, %v1155_v10  ;;  %v1150_v13 = vrot.slane %v1149_v9, 2  ;;  %v1169_v14 = vrot.slane %v1168_v11, 4  ;;  %v1336_v7 = vld [vmem:[#allocation5 + $0x508] sm:$0xff]  ;;  %v1342_v10 = vld [vmem:[#allocation5 + $0x538] sm:$0xff] }
 0x42c   : > { %v1157_v15 = vrot.slane %v1156_v12, 2  ;;  %v1151_v16 = vmax.f32 %v1149_v9, %v1150_v13  ;;  %v1170_v17 = vmax.f32 %v1168_v11, %v1169_v14  ;;  %v1338_v9 = vld [vmem:[#allocation5 + $0x518] sm:$0xff]  ;;  %v2369_v11 = vpack.c.bf16 %v1331_v0, %v1327_v63  ;;  %v1335_v13 = vld [vmem:[#allocation5 + $0x500] sm:$0xff] }
 0x42d   : > { %v1339_v14 = vld [vmem:[#allocation5 + $0x520] sm:$0xff] }
 0x42e   : > { %v1158_v2 = vmax.f32 %v1156_v12, %v1157_v15  ;;  %v1171_v19 = vrot.slane %v1170_v17, 2  ;;  %v1152_v20 = vrot.slane %v1151_v16, 1  ;;  %v2497_v12 = vpack.c.bf16 %v1333_v6, %v1329_v5  ;;  %v1367_v63 = vld [vmem:[#allocation5 + $0x600] sm:$0xff]  ;;  %v1369_v5 = vld [vmem:[#allocation5 + $0x610] sm:$0xff] }
 0x42f   : > { %v2371_v15 = vpack.c.bf16 %v1340_v8, %v1336_v7  ;;  %v2373_v22 = vpack.c.bf16 %v1339_v14, %v1335_v13  ;;  %v1371_v0 = vld [vmem:[#allocation5 + $0x620] sm:$0xff]  ;;  %v1373_v6 = vld [vmem:[#allocation5 + $0x630] sm:$0xff]  ;;  %v1376_v7 = vld [vmem:[#allocation5 + $0x648] sm:$0xff] }
 0x430   : > { %v1159_v24 = vrot.slane %v1158_v2, 1  ;;  %v1172_v25 = vmax.f32 %v1170_v17, %v1171_v19  ;;  %v1153_v36 = vmax.f32 %v1151_v16, %v1152_v20  ;;  %v2499_v16 = vpack.c.bf16 %v1342_v10, %v1338_v9  ;;  %v1337_v17 = vld [vmem:[#allocation5 + $0x510] sm:$0xff]  ;;  %v1348_v19 = vld [vmem:[#allocation5 + $0x568] sm:$0xff]  ;;  %v1346_v20 = vld [vmem:[#allocation5 + $0x558] sm:$0xff] }
 0x431   : > { %v2375_v26 = vpack.c.bf16 %v1348_v19, %v1344_v18  ;;  %v2503_v27 = vpack.c.bf16 %v1350_v21, %v1346_v20  ;;  %v1380_v8 = vld [vmem:[#allocation5 + $0x668] sm:$0xff]  ;;  %v1378_v9 = vld [vmem:[#allocation5 + $0x658] sm:$0xff]  ;;  %v1375_v13 = vld [vmem:[#allocation5 + $0x640] sm:$0xff] }
 0x432   : > { %v1160_v30 = vmax.f32 %v1158_v2, %v1159_v24  ;;  %v1173_v33 = vrot.slane %v1172_v25, 1  ;;  %v1341_v2 = vld [vmem:[#allocation5 + $0x530] sm:$0xff]  ;;  %v1343_v24 = vld [vmem:[#allocation5 + $0x540] sm:$0xff]  ;;  %v1382_v10 = vld [vmem:[#allocation5 + $0x678] sm:$0xff] }
 0x433   : > { %v2501_v23 = vpack.c.bf16 %v1341_v2, %v1337_v17  ;;  %v1379_v14 = vld [vmem:[#allocation5 + $0x660] sm:$0xff]  ;;  %v1377_v17 = vld [vmem:[#allocation5 + $0x650] sm:$0xff]  ;;  %v1384_v18 = vld [vmem:[#allocation5 + $0x688] sm:$0xff] }
 0x434   : > { %1517 = vmatprep.mubr.f32.mxu1 %v1160_v30  ;;  %1659 = vmatprep.mubr.f32.mxu0 %v1160_v30  ;;  %v1174_v42 = vmax.f32 %v1172_v25, %v1173_v33  ;;  %v1347_v25 = vld [vmem:[#allocation5 + $0x560] sm:$0xff]  ;;  %v1352_v30 = vld [vmem:[#allocation5 + $0x588] sm:$0xff]  ;;  %v1358_v33 = vld [vmem:[#allocation5 + $0x5b8] sm:$0xff] }
 0x435   : > { %1518 = vmatmul.mubr.f32.vlgmr.msra.gmra.mrb[2].mxu1 %v1153_v36  ;;  %1660 = vmatmul.mubr.f32.vlgmr.msra.gmra.mrb[4].mxu0 %v1153_v36  ;;  %v2377_v34 = vpack.c.bf16 %v1347_v25, %v1343_v24  ;;  %v1351_v36 = vld [vmem:[#allocation5 + $0x580] sm:$0xff]  ;;  %v1381_v2 = vld [vmem:[#allocation5 + $0x670] sm:$0xff]  ;;  %v1388_v19 = vld [vmem:[#allocation5 + $0x6a8] sm:$0xff] }
 0x436   : > { %2358 = vmatpush1.bf16.msra.mxu1 %v2357_v31  ;;  %2486 = vmatpush1.bf16.msra.mxu0 %v2485_v32  ;;  %v1356_v31 = vld [vmem:[#allocation5 + $0x5a8] sm:$0xff]  ;;  %v1354_v32 = vld [vmem:[#allocation5 + $0x598] sm:$0xff]  ;;  %v1383_v24 = vld [vmem:[#allocation5 + $0x680] sm:$0xff] }
 0x437   : > { %1588 = vmatprep.mubr.f32.mxu1 %v1174_v42  ;;  %1730 = vmatprep.mubr.f32.mxu0 %v1174_v42  ;;  %v2379_v40 = vpack.c.bf16 %v1356_v31, %v1352_v30  ;;  %v2507_v41 = vpack.c.bf16 %v1358_v33, %v1354_v32  ;;  %v1353_v42 = vld [vmem:[#allocation5 + $0x590] sm:$0xff]  ;;  %v1386_v20 = vld [vmem:[#allocation5 + $0x698] sm:$0xff]  ;;  %v1387_v25 = vld [vmem:[#allocation5 + $0x6a0] sm:$0xff] }
 0x438   : > { %2360 = vmatprep.subr.bf16.mxu1 %v2359_v43  ;;  %2488 = vmatprep.subr.bf16.mxu0 %v2487_v44  ;;  %v1357_v43 = vld [vmem:[#allocation5 + $0x5b0] sm:$0xff]  ;;  %v1360_v44 = vld [vmem:[#allocation5 + $0x5c8] sm:$0xff]  ;;  %v1390_v21 = vld [vmem:[#allocation5 + $0x6b8] sm:$0xff] }
 0x439   : > { %v1392_v30 = vld [vmem:[#allocation5 + $0x6c8] sm:$0xff]  ;;  %v1394_v32 = vld [vmem:[#allocation5 + $0x6d8] sm:$0xff] }
 0x43a   : > { %2362 = vmatpush1.bf16.msra.mxu1 %v2361_v49  ;;  %2490 = vmatpush1.bf16.msra.mxu0 %v2489_v50  ;;  %v2381_v49 = vpack.c.bf16 %v1355_v37, %v1351_v36  ;;  %v2509_v50 = vpack.c.bf16 %v1357_v43, %v1353_v42  ;;  %v1396_v31 = vld [vmem:[#allocation5 + $0x6e8] sm:$0xff]  ;;  %v1398_v33 = vld [vmem:[#allocation5 + $0x6f8] sm:$0xff]  ;;  %v1391_v36 = vld [vmem:[#allocation5 + $0x6c0] sm:$0xff] }
 0x43b   : > { %2364 = vmatprep.subr.bf16.mxu1 %v2363_v39  ;;  %2492 = vmatprep.subr.bf16.mxu0 %v2491_v54  ;;  %v2383_v39 = vpack.c.bf16 %v1364_v46, %v1360_v44  ;;  %v2511_v54 = vpack.c.bf16 %v1366_v48, %v1362_v47  ;;  %v1395_v37 = vld [vmem:[#allocation5 + $0x6e0] sm:$0xff]  ;;  %v1393_v42 = vld [vmem:[#allocation5 + $0x6d0] sm:$0xff]  ;;  %v1400_v44 = vld [vmem:[#allocation5 + $0x708] sm:$0xff]  ;;  %v1161_v46 = vsel %vm818_vm1, %v3193_v4, -inf }
 0x43c   : > { %v1397_v43 = vld [vmem:[#allocation5 + $0x6f0] sm:$0xff]  ;;  %v1404_v47 = vld [vmem:[#allocation5 + $0x728] sm:$0xff]  ;;  %v1402_v48 = vld [vmem:[#allocation5 + $0x718] sm:$0xff] }
 0x43d   : > { %v1414_v4 = vld [vmem:[#allocation5 + $0x778] sm:$0xff] }
 0x43e   : > { %2366 = vmatpush1.bf16.msra.mxu1 %v2365_v60  ;;  %2494 = vmatpush1.bf16.msra.mxu0 %v2493_v61  ;;  %v2385_v60 = vpack.c.bf16 %v1363_v52, %v1359_v51  ;;  %v2513_v61 = vpack.c.bf16 %v1365_v56, %v1361_v55  ;;  %v2529_v51 = vpack.c.bf16 %v1397_v43, %v1393_v42  ;;  %v1399_v52 = vld [vmem:[#allocation5 + $0x700] sm:$0xff]  ;;  %v1742_v43 = vld [vmem:[%s3474_s9 + $0x8] sm:$0xff] }
 0x43f   : > { %2368 = vmatprep.subr.bf16.mxu1 %v2367_v1  ;;  %2496 = vmatprep.subr.bf16.mxu0 %v2495_v3  ;;  %v2387_v1 = vpack.c.bf16 %v1372_v58, %v1368_v57  ;;  %v2515_v3 = vpack.c.bf16 %v1374_v59, %v1370_v45  ;;  %v2403_v55 = vpack.c.bf16 %v1404_v47, %v1400_v44  ;;  %v1401_v57 = vld [vmem:[#allocation5 + $0x710] sm:$0xff]  ;;  %v1408_v45 = vld [vmem:[#allocation5 + $0x748] sm:$0xff]  ;;  %v1741_v42 = vld [vmem:[%s3474_s9] sm:$0xff] }
 0x440   : > { %v1405_v58 = vld [vmem:[#allocation5 + $0x730] sm:$0xff]  ;;  %v1412_v59 = vld [vmem:[#allocation5 + $0x768] sm:$0xff]  ;;  %v2549_v47 = vpack.c.bf16 %v1742_v43, %v1741_v42  ;;  %v1792_v43 = vld [vmem:[%s3474_s9 + $0x198] sm:$0xff] }
 0x441   : > { %v1759_v44 = vld [vmem:[%s3474_s9 + $0x90] sm:$0xff] }
 0x442   : > { %2370 = vmatpush1.bf16.msra.mxu1 %v2369_v11  ;;  %2498 = vmatpush1.bf16.msra.mxu0 %v2497_v12  ;;  %v2389_v11 = vpack.c.bf16 %v1371_v0, %v1367_v63  ;;  %v2517_v12 = vpack.c.bf16 %v1373_v6, %v1369_v5  ;;  %v2533_v63 = vpack.c.bf16 %v1405_v58, %v1401_v57  ;;  %v1407_v0 = vld [vmem:[#allocation5 + $0x740] sm:$0xff]  ;;  %v1409_v6 = vld [vmem:[#allocation5 + $0x750] sm:$0xff]  ;;  %v1746_v57 = vld [vmem:[%s3474_s9 + $0x28] sm:$0xff] }
 0x443   : > { %2372 = vmatprep.subr.bf16.mxu1 %v2371_v15  ;;  %2500 = vmatprep.subr.bf16.mxu0 %v2499_v16  ;;  %v2391_v15 = vpack.c.bf16 %v1380_v8, %v1376_v7  ;;  %v2519_v16 = vpack.c.bf16 %v1382_v10, %v1378_v9  ;;  %v1413_v7 = vld [vmem:[#allocation5 + $0x770] sm:$0xff]  ;;  %v1416_v8 = vld [vmem:[#allocation5 + $0x788] sm:$0xff] }
 0x444   : > { %v1420_v10 = vld [vmem:[#allocation5 + $0x7a8] sm:$0xff]  ;;  %v1763_v58 = vld [vmem:[%s3474_s9 + $0xb0] sm:$0xff] }
 0x446   : > { %2374 = vmatpush1.bf16.msra.mxu1 %v2373_v22  ;;  %2502 = vmatpush1.bf16.msra.mxu0 %v2501_v23  ;;  %v2393_v22 = vpack.c.bf16 %v1379_v14, %v1375_v13  ;;  %v2521_v23 = vpack.c.bf16 %v1381_v2, %v1377_v17  ;;  %v2537_v14 = vpack.c.bf16 %v1413_v7, %v1409_v6  ;;  %v1750_v6 = vld [vmem:[%s3474_s9 + $0x48] sm:$0xff]  ;;  %v1767_v7 = vld [vmem:[%s3474_s9 + $0xd0] sm:$0xff] }
 0x447   : > { %2376 = vmatprep.subr.bf16.mxu1 %v2375_v26  ;;  %2504 = vmatprep.subr.bf16.mxu0 %v2503_v27  ;;  %v2395_v26 = vpack.c.bf16 %v1388_v19, %v1384_v18  ;;  %v2523_v27 = vpack.c.bf16 %v1390_v21, %v1386_v20  ;;  %v2411_v17 = vpack.c.bf16 %v1420_v10, %v1416_v8  ;;  %v1417_v18 = vld [vmem:[#allocation5 + $0x790] sm:$0xff]  ;;  %v1424_v20 = vld [vmem:[#allocation5 + $0x7c8] sm:$0xff]  ;;  %v1768_v8 = vld [vmem:[%s3474_s9 + $0xd8] sm:$0xff] }
 0x448   : > { %v1421_v19 = vld [vmem:[#allocation5 + $0x7b0] sm:$0xff]  ;;  %v2567_v10 = vpack.c.bf16 %v1768_v8, %v1767_v7  ;;  %v1800_v8 = vld [vmem:[%s3474_s9 + $0x1d8] sm:$0xff] }
 0x449   : > { %v1799_v7 = vld [vmem:[%s3474_s9 + $0x1d0] sm:$0xff] }
 0x44a   : > { %2378 = vmatpush1.bf16.msra.mxu1 %v2377_v34  ;;  %2506 = vmatpush1.bf16.msra.mxu0 %v2505_v35  ;;  %v2397_v34 = vpack.c.bf16 %v1387_v25, %v1383_v24  ;;  %v2525_v35 = vpack.c.bf16 %v1389_v29, %v1385_v28  ;;  %v1430_v24 = vld [vmem:[#allocation5 + $0x7f8] sm:$0xff] }
 0x44b   : > { %2380 = vmatprep.subr.bf16.mxu1 %v2379_v40  ;;  %2508 = vmatprep.subr.bf16.mxu0 %v2507_v41  ;;  %v2399_v40 = vpack.c.bf16 %v1396_v31, %v1392_v30  ;;  %v2527_v41 = vpack.c.bf16 %v1398_v33, %v1394_v32  ;;  %v1427_v30 = vld [vmem:[#allocation5 + $0x7e0] sm:$0xff]  ;;  %v1425_v31 = vld [vmem:[#allocation5 + $0x7d0] sm:$0xff] }
 0x44c   : > { %v1429_v32 = vld [vmem:[#allocation5 + $0x7f0] sm:$0xff] }
 0x44e   : > { %2382 = vmatpush1.bf16.msra.mxu1 %v2381_v49  ;;  %2510 = vmatpush1.bf16.msra.mxu0 %v2509_v50  ;;  %v1406_v49 = vld [vmem:[#allocation5 + $0x738] sm:$0xff]  ;;  %v2401_v50 = vpack.c.bf16 %v1395_v37, %v1391_v36  ;;  %v2545_v37 = vpack.c.bf16 %v1429_v32, %v1425_v31 }
 0x44f   : > { %2384 = vmatprep.subr.bf16.mxu1 %v2383_v39  ;;  %2512 = vmatprep.subr.bf16.mxu0 %v2511_v54  ;;  %v1403_v39 = vld [vmem:[#allocation5 + $0x720] sm:$0xff]  ;;  %v1162_v54 = vrot.slane %v1161_v46, 4  ;;  %v2531_v56 = vpack.c.bf16 %v1406_v49, %v1402_v48 }
 0x451   : > { %v1163_v9 = vmax.f32 %v1161_v46, %v1162_v54  ;;  %v1760_v46 = vld [vmem:[%s3474_s9 + $0x98] sm:$0xff] }
 0x452   : > { %2386 = vmatpush1.bf16.msra.mxu1 %v2385_v60  ;;  %2514 = vmatpush1.bf16.msra.mxu0 %v2513_v61  ;;  %v1410_v60 = vld [vmem:[#allocation5 + $0x758] sm:$0xff]  ;;  %v2405_v61 = vpack.c.bf16 %v1403_v39, %v1399_v52  ;;  %v2551_v49 = vpack.c.bf16 %v1760_v46, %v1759_v44  ;;  %v1761_v52 = vld [vmem:[%s3474_s9 + $0xa0] sm:$0xff]  ;;  %v1762_v39 = vld [vmem:[%s3474_s9 + $0xa8] sm:$0xff] }
 0x453   : > { %2388 = vmatprep.subr.bf16.mxu1 %v2387_v1  ;;  %2516 = vmatprep.subr.bf16.mxu0 %v2515_v3  ;;  %v1411_v1 = vld [vmem:[#allocation5 + $0x760] sm:$0xff]  ;;  %v2407_v3 = vpack.c.bf16 %v1412_v59, %v1408_v45  ;;  %v2535_v5 = vpack.c.bf16 %v1414_v4, %v1410_v60  ;;  %v1164_v21 = vrot.slane %v1163_v9, 2  ;;  %v1764_v45 = vld [vmem:[%s3474_s9 + $0xb8] sm:$0xff]  ;;  %v1747_v4 = vld [vmem:[%s3474_s9 + $0x30] sm:$0xff] }
 0x454   : > { %v2409_v13 = vpack.c.bf16 %v1411_v1, %v1407_v0  ;;  %v2559_v60 = vpack.c.bf16 %v1764_v45, %v1763_v58  ;;  %v1766_v0 = vld [vmem:[%s3474_s9 + $0xc8] sm:$0xff]  ;;  %v1795_v58 = vld [vmem:[%s3474_s9 + $0x1b0] sm:$0xff]  ;;  %v1796_v45 = vld [vmem:[%s3474_s9 + $0x1b8] sm:$0xff] }
 0x455   : > { %v1165_v33 = vmax.f32 %v1163_v9, %v1164_v21 }
 0x456   : > { %2390 = vmatpush1.bf16.msra.mxu1 %v2389_v11  ;;  %2518 = vmatpush1.bf16.msra.mxu0 %v2517_v12  ;;  %v1418_v11 = vld [vmem:[#allocation5 + $0x798] sm:$0xff] }
 0x457   : > { %2392 = vmatprep.subr.bf16.mxu1 %v2391_v15  ;;  %2520 = vmatprep.subr.bf16.mxu0 %v2519_v16  ;;  %v1422_v12 = vld [vmem:[#allocation5 + $0x7b8] sm:$0xff]  ;;  %v1415_v15 = vld [vmem:[#allocation5 + $0x780] sm:$0xff] }
 0x458   : > { %v1419_v16 = vld [vmem:[#allocation5 + $0x7a0] sm:$0xff]  ;;  %v2539_v2 = vpack.c.bf16 %v1422_v12, %v1418_v11  ;;  %v1751_v11 = vld [vmem:[%s3474_s9 + $0x50] sm:$0xff]  ;;  %v1752_v12 = vld [vmem:[%s3474_s9 + $0x58] sm:$0xff] }
 0x459   : > { %v2413_v25 = vpack.c.bf16 %v1419_v16, %v1415_v15  ;;  %v2569_v15 = vpack.c.bf16 %v1752_v12, %v1751_v11  ;;  %v1783_v11 = vld [vmem:[%s3474_s9 + $0x150] sm:$0xff]  ;;  %v1784_v12 = vld [vmem:[%s3474_s9 + $0x158] sm:$0xff] }
 0x45a   : > { %2394 = vmatpush1.bf16.msra.mxu1 %v2393_v22  ;;  %2522 = vmatpush1.bf16.msra.mxu0 %v2521_v23  ;;  %v1428_v22 = vld [vmem:[#allocation5 + $0x7e8] sm:$0xff]  ;;  %v1426_v23 = vld [vmem:[#allocation5 + $0x7d8] sm:$0xff] }
 0x45b   : > { %2396 = vmatprep.subr.bf16.mxu1 %v2395_v26  ;;  %2524 = vmatprep.subr.bf16.mxu0 %v2523_v27  ;;  %v2541_v26 = vpack.c.bf16 %v1421_v19, %v1417_v18  ;;  %v1423_v27 = vld [vmem:[#allocation5 + $0x7c0] sm:$0xff]  ;;  %v2415_v28 = vpack.c.bf16 %v1428_v22, %v1424_v20  ;;  %v2543_v29 = vpack.c.bf16 %v1430_v24, %v1426_v23  ;;  %v1771_v19 = vld [vmem:[%s3474_s9 + $0xf0] sm:$0xff]  ;;  %v1772_v20 = vld [vmem:[%s3474_s9 + $0xf8] sm:$0xff] }
 0x45c   : > { %v2417_v36 = vpack.c.bf16 %v1427_v30, %v1423_v27  ;;  %v2575_v21 = vpack.c.bf16 %v1772_v20, %v1771_v19  ;;  %v1755_v22 = vld [vmem:[%s3474_s9 + $0x70] sm:$0xff]  ;;  %v1756_v23 = vld [vmem:[%s3474_s9 + $0x78] sm:$0xff] }
 0x45d   : > { %v2577_v24 = vpack.c.bf16 %v1756_v23, %v1755_v22  ;;  %v1803_v19 = vld [vmem:[%s3474_s9 + $0x1f0] sm:$0xff]  ;;  %v1804_v20 = vld [vmem:[%s3474_s9 + $0x1f8] sm:$0xff] }
 0x45e   : > { %2398 = vmatpush1.bf16.msra.mxu1 %v2397_v34  ;;  %2526 = vmatpush1.bf16.msra.mxu0 %v2525_v35  ;;  %v1757_v34 = vld [vmem:[%s3474_s9 + $0x80] sm:$0xff]  ;;  %v1758_v35 = vld [vmem:[%s3474_s9 + $0x88] sm:$0xff]  ;;  %v2607_v22 = vpack.c.bf16 %v1804_v20, %v1803_v19  ;;  %v1787_v23 = vld [vmem:[%s3474_s9 + $0x170] sm:$0xff] }
 0x45f   : > { %2400 = vmatprep.subr.bf16.mxu1 %v2399_v40  ;;  %2528 = vmatprep.subr.bf16.mxu0 %v2527_v41  ;;  %v1166_v40 = vrot.slane %v1165_v33, 1  ;;  %v2547_v41 = vpack.c.bf16 %v1758_v35, %v1757_v34 }
 0x461   : > { %v1167_v48 = vmax.f32 %v1165_v33, %v1166_v40  ;;  %v1773_v40 = vld [vmem:[%s3474_s9 + $0x100] sm:$0xff] }
 0x462   : > { %2402 = vmatpush1.bf16.msra.mxu1 %v2401_v50  ;;  %2530 = vmatpush1.bf16.msra.mxu0 %v2529_v51  ;;  %v1743_v50 = vld [vmem:[%s3474_s9 + $0x10] sm:$0xff]  ;;  %v1744_v51 = vld [vmem:[%s3474_s9 + $0x18] sm:$0xff] }
 0x463   : > { %2404 = vmatprep.subr.bf16.mxu1 %v2403_v55  ;;  %2532 = vmatprep.subr.bf16.mxu0 %v2531_v56  ;;  %v2553_v54 = vpack.c.bf16 %v1744_v51, %v1743_v50  ;;  %v2555_v55 = vpack.c.bf16 %v1762_v39, %v1761_v52  ;;  %v1745_v56 = vld [vmem:[%s3474_s9 + $0x20] sm:$0xff]  ;;  %v1776_v50 = vld [vmem:[%s3474_s9 + $0x118] sm:$0xff]  ;;  %v1794_v39 = vld [vmem:[%s3474_s9 + $0x1a8] sm:$0xff] }
 0x464   : > { %v2557_v59 = vpack.c.bf16 %v1746_v57, %v1745_v56  ;;  %v1793_v52 = vld [vmem:[%s3474_s9 + $0x1a0] sm:$0xff]  ;;  %v1778_v57 = vld [vmem:[%s3474_s9 + $0x128] sm:$0xff] }
 0x465   : > { %v1777_v56 = vld [vmem:[%s3474_s9 + $0x120] sm:$0xff] }
 0x466   : > { %2406 = vmatpush1.bf16.msra.mxu1 %v2405_v61  ;;  %2534 = vmatpush1.bf16.msra.mxu0 %v2533_v63  ;;  %v1748_v61 = vld [vmem:[%s3474_s9 + $0x38] sm:$0xff]  ;;  %v1765_v63 = vld [vmem:[%s3474_s9 + $0xc0] sm:$0xff] }
 0x467   : > { %2408 = vmatprep.subr.bf16.mxu1 %v2407_v3  ;;  %2536 = vmatprep.subr.bf16.mxu0 %v2535_v5  ;;  %v2561_v1 = vpack.c.bf16 %v1748_v61, %v1747_v4  ;;  %v2563_v3 = vpack.c.bf16 %v1766_v0, %v1765_v63  ;;  %v1749_v5 = vld [vmem:[%s3474_s9 + $0x40] sm:$0xff]  ;;  %v1779_v4 = vld [vmem:[%s3474_s9 + $0x130] sm:$0xff]  ;;  %v1780_v61 = vld [vmem:[%s3474_s9 + $0x138] sm:$0xff] }
 0x468   : > { %v2565_v9 = vpack.c.bf16 %v1750_v6, %v1749_v5  ;;  %v1797_v63 = vld [vmem:[%s3474_s9 + $0x1c0] sm:$0xff]  ;;  %v1798_v0 = vld [vmem:[%s3474_s9 + $0x1c8] sm:$0xff] }
 0x469   : > { %v1781_v5 = vld [vmem:[%s3474_s9 + $0x140] sm:$0xff]  ;;  %v1782_v6 = vld [vmem:[%s3474_s9 + $0x148] sm:$0xff] }
 0x46a   : > { %2410 = vmatpush1.bf16.msra.mxu1 %v2409_v13  ;;  %2538 = vmatpush1.bf16.msra.mxu0 %v2537_v14  ;;  %v1769_v13 = vld [vmem:[%s3474_s9 + $0xe0] sm:$0xff]  ;;  %v1770_v14 = vld [vmem:[%s3474_s9 + $0xe8] sm:$0xff] }
 0x46b   : > { %2412 = vmatprep.subr.bf16.mxu1 %v2411_v17  ;;  %2540 = vmatprep.subr.bf16.mxu0 %v2539_v2  ;;  %v2571_v16 = vpack.c.bf16 %v1770_v14, %v1769_v13  ;;  %v1753_v17 = vld [vmem:[%s3474_s9 + $0x60] sm:$0xff]  ;;  %v1754_v2 = vld [vmem:[%s3474_s9 + $0x68] sm:$0xff] }
 0x46c   : > { %v2573_v18 = vpack.c.bf16 %v1754_v2, %v1753_v17  ;;  %v1801_v13 = vld [vmem:[%s3474_s9 + $0x1e0] sm:$0xff]  ;;  %v1802_v14 = vld [vmem:[%s3474_s9 + $0x1e8] sm:$0xff] }
 0x46d   : > { %v2603_v17 = vpack.c.bf16 %v1802_v14, %v1801_v13  ;;  %v1785_v2 = vld [vmem:[%s3474_s9 + $0x160] sm:$0xff] }
 0x46e   : > { %2414 = vmatpush1.bf16.msra.mxu1 %v2413_v25  ;;  %2542 = vmatpush1.bf16.msra.mxu0 %v2541_v26  ;;  %v1789_v25 = vld [vmem:[%s3474_s9 + $0x180] sm:$0xff]  ;;  %v1790_v26 = vld [vmem:[%s3474_s9 + $0x188] sm:$0xff] }
 0x46f   : > { %2416 = vmatprep.subr.bf16.mxu1 %v2415_v28  ;;  %2544 = vmatprep.subr.bf16.mxu0 %v2543_v29  ;;  %v2579_v27 = vpack.c.bf16 %v1790_v26, %v1789_v25  ;;  %v3307_v28 = vld [vmem:[%s3473_s8] sm:$0xf]  ;;  %v1447_v29 = vsub.s32 3, %v3107_v62 }
 0x470   : > { %v1436_v30 = vrot.slane %v3307_v28, %v964_v38  ;;  %v1440_v31 = vrot.slane %v3307_v28, %v968_v53  ;;  %v1774_v38 = vld [vmem:[%s3474_s9 + $0x108] sm:$0xff]  ;;  %v1791_v53 = vld [vmem:[%s3474_s9 + $0x190] sm:$0xff] }
 0x471   : > { %v1448_v32 = vrot.slane %v3307_v28, %v1447_v29  ;;  %v2581_v46 = vpack.c.bf16 %v1774_v38, %v1773_v40 }
 0x472   : > { %2418 = vmatpush1.bf16.msra.mxu1 %v2417_v36  ;;  %2546 = vmatpush1.bf16.msra.mxu0 %v2545_v37 }
 0x473   : > { %2548 = vmatprep.subr.bf16.mxu1 %v2547_v41 }
 0x475   : > { %1589 = vmatmul.mubr.f32.vlgmr.msra.gmra.mrb[2].mxu1 %v1167_v48  ;;  %1731 = vmatmul.mubr.f32.vlgmr.msra.gmra.mrb[4].mxu0 %v1167_v48  ;;  %v2583_v48 = vpack.c.bf16 %v1792_v43, %v1791_v53 }
 0x476   : > { %2550 = vmatpush3.bf16.msra.mxu1 %v2549_v47 }
 0x477   : > { %2552 = vmatprep.subr.bf16.mxu1 %v2551_v49  ;;  %v1775_v49 = vld [vmem:[%s3474_s9 + $0x110] sm:$0xff] }
 0x47a   : > { %2554 = vmatpush3.bf16.msra.mxu1 %v2553_v54  ;;  %v2585_v54 = vpack.c.bf16 %v1776_v50, %v1775_v49 }
 0x47b   : > { %2556 = vmatprep.subr.bf16.mxu1 %v2555_v55  ;;  %v2587_v55 = vpack.c.bf16 %v1794_v39, %v1793_v52 }
 0x47e   : > { %2558 = vmatpush3.bf16.msra.mxu1 %v2557_v59  ;;  %v2589_v59 = vpack.c.bf16 %v1778_v57, %v1777_v56 }
 0x47f   : > { %2560 = vmatprep.subr.bf16.mxu1 %v2559_v60  ;;  %v2591_v60 = vpack.c.bf16 %v1796_v45, %v1795_v58 }
 0x482   : > { %2562 = vmatpush3.bf16.msra.mxu1 %v2561_v1  ;;  %v2593_v1 = vpack.c.bf16 %v1780_v61, %v1779_v4 }
 0x483   : > { %2564 = vmatprep.subr.bf16.mxu1 %v2563_v3  ;;  %v2595_v3 = vpack.c.bf16 %v1798_v0, %v1797_v63 }
 0x486   : > { %2566 = vmatpush3.bf16.msra.mxu1 %v2565_v9  ;;  %v2597_v9 = vpack.c.bf16 %v1782_v6, %v1781_v5 }
 0x487   : > { %2568 = vmatprep.subr.bf16.mxu1 %v2567_v10  ;;  %v2599_v10 = vpack.c.bf16 %v1800_v8, %v1799_v7 }
 0x48a   : > { %2570 = vmatpush3.bf16.msra.mxu1 %v2569_v15  ;;  %v2601_v15 = vpack.c.bf16 %v1784_v12, %v1783_v11 }
 0x48b   : > { %2572 = vmatprep.subr.bf16.mxu1 %v2571_v16  ;;  %v1443_v16 = vsub.s32 2, %v3107_v62 }
 0x48e   : > { %2574 = vmatpush3.bf16.msra.mxu1 %v2573_v18  ;;  %v1786_v18 = vld [vmem:[%s3474_s9 + $0x168] sm:$0xff] }
 0x48f   : > { %2576 = vmatprep.subr.bf16.mxu1 %v2575_v21  ;;  %v2605_v62 = vpack.c.bf16 %v1786_v18, %v1785_v2  ;;  %v1444_v21 = vrot.slane %v3307_v28, %v1443_v16 }
 0x492   : > { %2578 = vmatpush3.bf16.msra.mxu1 %v2577_v24  ;;  %v1788_v24 = vld [vmem:[%s3474_s9 + $0x178] sm:$0xff] }
 0x493   : > { %2580 = vmatprep.subr.bf16.mxu1 %v2579_v27  ;;  %v2609_v25 = vpack.c.bf16 %v1788_v24, %v1787_v23 }
 0x548   : > { %v1590_v33 = vpop.f32.mrb[2].mxu1  ;;  %v3317_v34 = vpop.f32.mrb[4].mxu0 }
 0x549   : > { %v2613_v35 = vadd.f32 %v1590_v33, %v1436_v30  ;;  %v1592_v36 = vpop.f32.mrb[3].mxu1  ;;  %v1734_v37 = vpop.f32.mrb[5].mxu0  ;;  %v2615_v26 = vadd.f32 %v3317_v34, %v1444_v21 }
 0x54a   : > { %v2614_v41 = vadd.f32 %v1592_v36, %v1440_v31  ;;  %v2616_v42 = vadd.f32 %v1734_v37, %v1448_v32  ;;  %v1805_v31 = vld [vmem:[%s3475_s10] sm:$0x1] }
 0x54b   : > { %v1737_v47 = vmax.f32 %v2613_v35, 0.0  ;;  %v1739_v27 = vmax.f32 %v2615_v26, 0.0 }
 0x54c   : > { %v1738_v44 = vmax.f32 %v2614_v41, 0.0  ;;  %v1740_v51 = vmax.f32 %v2616_v42, 0.0 }
 0x54e   : > { %1870 = vmatprep.mubr.f32.mxu1 %v1738_v44 }
 0x54f   : > { %1871 = vmatmul.mubr.f32.vlgmr.msra.gmra.mrb[4].mxu1 %v1737_v47 }
 0x550   : > { %2582 = vmatpush3.bf16.msra.mxu1 %v2581_v46  ;;  %1940 = vmatprep.mubr.f32.mxu1 %v1740_v51 }
 0x551   : > { %2584 = vmatprep.subr.bf16.mxu1 %v2583_v48 }
 0x554   : > { %2586 = vmatpush3.bf16.msra.mxu1 %v2585_v54 }
 0x555   : > { %2588 = vmatprep.subr.bf16.mxu1 %v2587_v55 }
 0x558   : > { %2590 = vmatpush3.bf16.msra.mxu1 %v2589_v59 }
 0x559   : > { %2592 = vmatprep.subr.bf16.mxu1 %v2591_v60 }
 0x55c   : > { %2594 = vmatpush3.bf16.msra.mxu1 %v2593_v1 }
 0x55d   : > { %2596 = vmatprep.subr.bf16.mxu1 %v2595_v3 }
 0x560   : > { %2598 = vmatpush3.bf16.msra.mxu1 %v2597_v9 }
 0x561   : > { %2600 = vmatprep.subr.bf16.mxu1 %v2599_v10 }
 0x564   : > { %2602 = vmatpush3.bf16.msra.mxu1 %v2601_v15 }
 0x565   : > { %2604 = vmatprep.subr.bf16.mxu1 %v2603_v17 }
 0x568   : > { %2606 = vmatpush3.bf16.msra.mxu1 %v2605_v62 }
 0x569   : > { %2608 = vmatprep.subr.bf16.mxu1 %v2607_v22 }
 0x56c   : > { %2610 = vmatpush3.bf16.msra.mxu1 %v2609_v25 }
 0x56f   : > { %1941 = vmatmul.mubr.f32.vlgmr.msra.gmra.mrb[6].mxu1 %v1739_v27 }
 0x622   : > { %v2108_v29 = vpop.f32.mrb[4].mxu1 }
 0x623   : > { %v2109_v28 = vpop.f32.mrb[5].mxu1 }
 0x624   : > { %v2110_v30 = vadd.f32 %v2109_v28, %v2108_v29 }
 0x626   : > { %v1873_v35 = vadd.f32 %v2110_v30, %v1805_v31 }
 0x642   : > { %v2143_v32 = vpop.f32.mrb[6].mxu1 }
 0x643   : > { %v2144_v33 = vpop.f32.mrb[7].mxu1 }
 0x644   : > { %v2145_v36 = vadd.f32 %v2144_v33, %v2143_v32 }
 0x646   : > { %v1943_v37 = vadd.f32 %v2145_v36, %v1873_v35 }
 0x648   : > { %v1947_v34 = vsel %vm1946_vm4, %v1943_v37, -inf }
 0x649   : > { %1948 = vmax.xlane.f32.xlu1 %v1947_v34 }
 0x6d6   : > { %v1949_v40 = vpop.xlane.xlu1 %1948 }
 0x6d7   : > { %v1950_v38 = vsub.f32 %v1943_v37, %v1949_v40 }
 0x6d9   : > { %v1951_v41 = vmul.f32 1.442695, %v1950_v38 }
 0x6db   : > { %2694 = vpow2.f32 %v1951_v41 }
 0x6e5   : > { %v2695_v42 = vpop.eup %2694 }
 0x6e6   : > { %v1953_v53 = vsel %vm1946_vm4, %v2695_v42, 0.0 }
 0x6e7   : > { %1954 = vadd.xlane.f32.xlu0 %v1953_v53 }
 0x774   : > { %v1955_v43 = vpop.xlane.xlu0 %1954 }
 0x775   : > { %2696 = vrcp.f32 %v1955_v43 }
 0x77f   : > { %v2697_v44 = vpop.eup %2696 }
 0x780   : > { %v1957_v46 = vmul.f32 %v2697_v44, %v2695_v42 }
 0x782   : > { %1958 = vst.msk [vmem:[%s408_s26] sm:$0x1] %vm1946_vm4, %v1957_v46 }
 0x783   : > { %2767 = shalt.err (!%p2764_p11)
}
 0x784   : > { %s2768_s16 = scalar_lea.hbm %s3422_s14, 16  ;;  %s2772_s22 = scalar_lea.hbm %s3476_s11, 32 }
 0x785   : > { %p2769_p13 = scmp.ne.s32.totalorder %s3422_s14, %s2768_s16  ;;  %p2773_p6 = scmp.lt.u32.totalorder %s3422_s14, %s3476_s11 }
 0x786   : > { %p2774_p9 = scmp.lt.u32.totalorder %s2772_s22, %s2768_s16  ;;  %p2776_p12 = scmp.lt.u32.totalorder %s2768_s16, %s3422_s14 }
 0x787   : > { %p2770_p0 = pnand %p2769_p13, %p3499_p1 }
 0x788   : > { %p2775_p10 = por %p2774_p9, %p2773_p6 }
 0x789   : > { %p2771_p5 = pneg %p2770_p0 }
 0x78a   : > { %p2777_p2 = por %p2776_p12, %p2775_p10 }
 0x78c   : > { %p2778_p3 = pnand %p2777_p2, %p2771_p5 }
 0x78e   : > { %2781 = shalt.err (!%p2778_p3)
}
 0x78f   : > { %2631 = dma.vmem_to_hbm [thread:$0]  (%p3499_p1), %s3424_s24, 16, %s3422_s14, %s1960_s12  }
 0x790 PF: > { %s3500_s26 = sld [smem:[#allocation11_spill]]  ;;  %s3501_s25 = sld [smem:[#allocation15_spill]] }
 0x791   : > { %p2648_p4 = scmp.ge.s32.totalorder %s2824_s20, 2 }
 0x796   : > { %s1984_s30 = sand.u32 1, %s3500_s26   ;;  %p3502_p7 = scmp.ne.s32.totalorder %s3501_s25, 0 }
 0x797   : > { %s1985_s17 = scalar_lea.sflag [#allocation4], %s1984_s30 }
 0x798   : > { %p2641_p8 = pnand %p2648_p4, %p3502_p7 }
 0x79a   : > { %2807 = dma.done.wait (!%p2641_p8), %s1985_s17, 16  }
 0x79b   : > { %2809 = vsyncadd (!%p2641_p8), %s1985_s17, 4294967280  ;;  %s3503_s20 = sld [smem:[#allocation13_spill]]  ;;  %s3504_s21 = sld [smem:[#allocation12_spill]] }
 0x79c   : > { %s3505_s19 = sld [smem:[#allocation14_spill]]  ;;  %s3506_s17 = smov %s2816_s18 }
 0x7a1   : > { %p23_p11 = scmp.ge.s32.totalorder %s3503_s20, 4   ;;  %s3507_s18 = smov %s3504_s21 }
 0x7a3   :  { %25 = sbr.rel (!%p23_p11) target bundleno = 5 (0x5), region = 108 }
 0x7aa   :  { %1989 = vsyncpa [#allocation3], 1 }
 0x7ab   :  { %1991 = vsyncpa [#allocation3 + $0x1], 1 }
 0x7ac   :  { %1992 = vsyncpa [#allocation6], 1 }
 0x7ad   :  { %1993 = vsyncpa [#allocation4], 1 }
 0x7ae   :  { %1995 = vsyncpa [#allocation4 + $0x1], 1 }

</bundles_post_ra>
